<compile_context>
chip_gen: v6e
topology: v6e:2x2x1
jax: 0.10.0
libtpu: 0.0.40
codegen_flags: <defaults>
</compile_context>

<pallas_src>
import jax
import jax.numpy as jnp
from jax.experimental import pallas as pl
from jax.experimental.pallas import tpu as pltpu


def _cond_seq_kernel(x_ref, c_ref, w1_ref, wc1_ref, b1_ref,
                     w2_ref, wc2_ref, b2_ref, o_ref):
    """Conditioned path: two accumulating dots per layer, f32 accumulate."""
    bf = jnp.bfloat16
    x = x_ref[...].astype(bf)                         # (TB, H) bf16 (cast in-kernel)
    c = c_ref[...].astype(bf)                         # (TB, C) bf16
    # ---- layer 1 ----
    h = (jnp.dot(x, w1_ref[...], preferred_element_type=jnp.float32)
         + jnp.dot(c, wc1_ref[...], preferred_element_type=jnp.float32)
         + b1_ref[...])
    h = jax.nn.gelu(h, approximate=True)              # f32 epilogue, tanh -> EUP
    # ---- layer 2 ----
    y = (jnp.dot(h.astype(bf), w2_ref[...], preferred_element_type=jnp.float32)
         + jnp.dot(c, wc2_ref[...], preferred_element_type=jnp.float32)
         + b2_ref[...])
    o_ref[...] = y.astype(o_ref.dtype)


def _seq_kernel(x_ref, w1_ref, b1_ref, w2_ref, b2_ref, o_ref):
    """Unconditioned path (len(cond) == 0): plain two-layer MLP, no Wc DMA."""
    bf = jnp.bfloat16
    x = x_ref[...].astype(bf)
    h = jnp.dot(x, w1_ref[...], preferred_element_type=jnp.float32) + b1_ref[...]
    h = jax.nn.gelu(h, approximate=True)
    y = jnp.dot(h.astype(bf), w2_ref[...],
                preferred_element_type=jnp.float32) + b2_ref[...]
    o_ref[...] = y.astype(o_ref.dtype)


def _resident_spec(shape):
    """Constant-index (VMEM-resident) input; single-buffered to save VMEM."""
    index_map = lambda i: (0,) * len(shape)
    try:
        return pl.BlockSpec(shape, index_map, pipeline_mode=pl.Buffered(1))
    except TypeError:  # older BlockSpec without pipeline_mode kwarg
        return pl.BlockSpec(shape, index_map)


def cond_sequential(x, cond, params, *, tile_b=None, out_dtype=None):
    """Mirrors CondSequential.forward(x, *cond) for the two layers above."""
    w1, wc1, b1, w2, wc2, b2 = params
    B, H = x.shape
    out_dtype = x.dtype if out_dtype is None else out_dtype
    bf = jnp.bfloat16

    # Batch tile: aim for >= 4 grid steps (>= 2 per TC on v7x), <= 512 rows.
    if tile_b is None:
        tile_b = min(512, max(64, -(-B // 4)))
        tile_b = -(-tile_b // 8) * 8                   # sublane-align
    if tile_b >= B:
        tile_b = B                                     # single full-extent block
    grid = (pl.cdiv(B, tile_b),)                       # ragged last block masked by Pallas

    # Weights are small & resident: one-time bf16 cast in the wrapper is cheap.
    w1k = w1.astype(bf)
    w2k = w2.astype(bf)
    b1k = b1.astype(jnp.float32).reshape(1, H)
    b2k = b2.astype(jnp.float32).reshape(1, H)

    x_spec = pl.BlockSpec((tile_b, H), lambda i: (i, 0))
    out_spec = pl.BlockSpec((tile_b, H), lambda i: (i, 0))

    if cond is None:
        kernel = _seq_kernel
        operands = (x, w1k, b1k, w2k, b2k)
        in_specs = [
            x_spec,                                    # activations: tiled, double-buffered
            _resident_spec((H, H)),                    # W1
            _resident_spec((1, H)),                    # b1
            _resident_spec((H, H)),                    # W2
            _resident_spec((1, H)),                    # b2
        ]
        act_in_bytes = tile_b * H * x.dtype.itemsize
        weight_bytes = 2 * H * H * 2                   # two bf16 weights, single-buffered
    else:
        C = cond.shape[1]
        kernel = _cond_seq_kernel
        wc1k = wc1.astype(bf)
        wc2k = wc2.astype(bf)
        operands = (x, cond, w1k, wc1k, b1k, w2k, wc2k, b2k)
        in_specs = [
            x_spec,                                    # x: tiled
            pl.BlockSpec((tile_b, C), lambda i: (i, 0)),   # cond: tiled
            _resident_spec((H, H)),                    # W1
            _resident_spec((C, H)),                    # Wc1
            _resident_spec((1, H)),                    # b1
            _resident_spec((H, H)),                    # W2
            _resident_spec((C, H)),                    # Wc2
            _resident_spec((1, H)),                    # b2
        ]
        act_in_bytes = tile_b * (H * x.dtype.itemsize + C * cond.dtype.itemsize)
        weight_bytes = 2 * (H + C) * H * 2

    # VMEM budget: single-buffered bf16 weights + f32 biases + double-buffered
    # activation/output tiles + slack, capped with headroom below the physical
    # per-core capacity (v7x: 64 MiB/TC, v5e/v6e: 128 MiB).
    out_isize = jnp.dtype(out_dtype).itemsize
    budget = (weight_bytes
              + 2 * H * 4                              # f32 biases
              + 2 * act_in_bytes                       # double-buffered input tiles
              + 2 * tile_b * H * out_isize             # double-buffered output tile
              + (4 << 20))                             # slack / internal scratch
    try:
        capacity = pltpu.get_tpu_info().vmem_capacity_bytes
    except Exception:
        capacity = 64 << 20
    vmem_bytes = int(min(max(budget, 16 << 20), capacity - (8 << 20)))
    # TODO(synk): if resident weights alone exceed the VMEM cap (very large H),
    # add an output-feature grid axis and tile W/Wc instead of keeping them resident.

    out = pl.pallas_call(
        kernel,
        out_shape=jax.ShapeDtypeStruct((B, H), out_dtype),
        grid_spec=pltpu.PrefetchScalarGridSpec(
            num_scalar_prefetch=0,
            grid=grid,
            in_specs=in_specs,
            out_specs=out_spec,
        ),
        compiler_params=pltpu.CompilerParams(
            dimension_semantics=("parallel",),          # batch tiles shard across TCs (v7x)
            vmem_limit_bytes=vmem_bytes,
        ),
    )(*operands)
    return out


def init_params(key, hidden, cond_dim, dtype=jnp.float32):
    """Deterministic synthetic parameters for the two conditional layers."""
    k = jax.random.split(key, 6)
    scale_h = 1.0 / jnp.sqrt(hidden)
    scale_c = 1.0 / jnp.sqrt(cond_dim)
    w1 = (jax.random.normal(k[0], (hidden, hidden)) * scale_h).astype(dtype)
    wc1 = (jax.random.normal(k[1], (cond_dim, hidden)) * scale_c).astype(dtype)
    b1 = (jax.random.normal(k[2], (1, hidden)) * 0.01).astype(dtype)
    w2 = (jax.random.normal(k[3], (hidden, hidden)) * scale_h).astype(dtype)
    wc2 = (jax.random.normal(k[4], (cond_dim, hidden)) * scale_c).astype(dtype)
    b2 = (jax.random.normal(k[5], (1, hidden)) * 0.01).astype(dtype)
    return (w1, wc1, b1, w2, wc2, b2)


def reference(x, cond, params, out_dtype=None):
    """Plain-JAX reference of the same CondSequential instantiation.

    Mirrors the kernel's numerics: bf16 operands, f32 accumulation, f32
    bias/tanh-GELU epilogue, bf16 cast of the hidden activation before layer 2.
    """
    w1, wc1, b1, w2, wc2, b2 = params
    out_dtype = x.dtype if out_dtype is None else out_dtype
    bf = jnp.bfloat16
    xb = x.astype(bf)
    b1f = b1.astype(jnp.float32).reshape(1, -1)
    b2f = b2.astype(jnp.float32).reshape(1, -1)
    if cond is None:
        h = jnp.dot(xb, w1.astype(bf), preferred_element_type=jnp.float32) + b1f
        h = jax.nn.gelu(h, approximate=True)
        y = jnp.dot(h.astype(bf), w2.astype(bf),
                    preferred_element_type=jnp.float32) + b2f
    else:
        cb = cond.astype(bf)
        h = (jnp.dot(xb, w1.astype(bf), preferred_element_type=jnp.float32)
             + jnp.dot(cb, wc1.astype(bf), preferred_element_type=jnp.float32)
             + b1f)
        h = jax.nn.gelu(h, approximate=True)
        y = (jnp.dot(h.astype(bf), w2.astype(bf), preferred_element_type=jnp.float32)
             + jnp.dot(cb, wc2.astype(bf), preferred_element_type=jnp.float32)
             + b2f)
    return y.astype(out_dtype)


if __name__ == "__main__":
    # 4 batch tiles of 96 rows with the auto tile picker -> exercises the grid.
    B, H, C = 384, 256, 128
    key = jax.random.PRNGKey(0)
    kx, kc, kp = jax.random.split(key, 3)

    x = jax.random.normal(kx, (B, H), dtype=jnp.float32)
    cond = jax.random.normal(kc, (B, C), dtype=jnp.float32)
    params = init_params(kp, H, C)

    # Conditioned path (len(cond) > 0), f32 output (drop-in semantics).
    out = jax.block_until_ready(cond_sequential(x, cond, params))
    ref = reference(x, cond, params)
    assert out.shape == (B, H) and out.dtype == x.dtype
    assert jnp.allclose(out, ref, atol=2e-2, rtol=2e-2), "mismatch vs reference (cond)"

    # Conditioned path, bf16 output (halves output HBM traffic when allowed).
    out_bf = jax.block_until_ready(
        cond_sequential(x, cond, params, out_dtype=jnp.bfloat16))
    assert out_bf.dtype == jnp.bfloat16
    assert jnp.allclose(out_bf.astype(jnp.float32), ref, atol=6e-2, rtol=6e-2), \
        "mismatch vs reference (cond, bf16 out)"

    # Unconditioned path (len(cond) == 0) uses the specialized kernel (no Wc DMA).
    out_nc = jax.block_until_ready(cond_sequential(x, None, params))
    ref_nc = reference(x, None, params)
    assert jnp.allclose(out_nc, ref_nc, atol=2e-2, rtol=2e-2), "mismatch vs reference (no cond)"

    print("KERNEL_OK")
</pallas_src>

<mosaic_0001>
module attributes {stable_mosaic.version = 11 : i64} {
  func.func @_cond_seq_kernel(%arg0: i32, %arg1: memref<96x256xf32, #tpu.memory_space<vmem>>, %arg2: memref<96x128xf32, #tpu.memory_space<vmem>>, %arg3: memref<256x256xbf16, #tpu.memory_space<vmem>>, %arg4: memref<128x256xbf16, #tpu.memory_space<vmem>>, %arg5: memref<1x256xf32, #tpu.memory_space<vmem>>, %arg6: memref<256x256xbf16, #tpu.memory_space<vmem>>, %arg7: memref<128x256xbf16, #tpu.memory_space<vmem>>, %arg8: memref<1x256xf32, #tpu.memory_space<vmem>>, %arg9: memref<96x256xf32, #tpu.memory_space<vmem>>) attributes {dimension_semantics = [#tpu.dimension_semantics<parallel>], iteration_bounds = array<i64: 4>, scalar_prefetch = 0 : i64, scratch_operands = 0 : i64, tpu.core_type = #tpu.core_type<tc>, window_params = [{transform_indices = @transform_0, window_bounds = array<i64: 96, 256>}, {transform_indices = @transform_1, window_bounds = array<i64: 96, 128>}, {pipeline_mode = #tpu.pipeline_mode<synchronous>, transform_indices = @transform_2, window_bounds = array<i64: 256, 256>}, {pipeline_mode = #tpu.pipeline_mode<synchronous>, transform_indices = @transform_3, window_bounds = array<i64: 128, 256>}, {pipeline_mode = #tpu.pipeline_mode<synchronous>, transform_indices = @transform_4, window_bounds = array<i64: 1, 256>}, {pipeline_mode = #tpu.pipeline_mode<synchronous>, transform_indices = @transform_5, window_bounds = array<i64: 256, 256>}, {pipeline_mode = #tpu.pipeline_mode<synchronous>, transform_indices = @transform_6, window_bounds = array<i64: 128, 256>}, {pipeline_mode = #tpu.pipeline_mode<synchronous>, transform_indices = @transform_7, window_bounds = array<i64: 1, 256>}, {transform_indices = @transform_8, window_bounds = array<i64: 96, 256>}]} {
    %c0 = arith.constant 0 : index
    %c0_0 = arith.constant 0 : index
    %0 = vector.load %arg1[%c0, %c0_0] : memref<96x256xf32, #tpu.memory_space<vmem>>, vector<96x256xf32>
    %1 = arith.truncf %0 : vector<96x256xf32> to vector<96x256xbf16>
    %c0_1 = arith.constant 0 : index
    %c0_2 = arith.constant 0 : index
    %2 = vector.load %arg2[%c0_1, %c0_2] : memref<96x128xf32, #tpu.memory_space<vmem>>, vector<96x128xf32>
    %3 = arith.truncf %2 : vector<96x128xf32> to vector<96x128xbf16>
    %c0_3 = arith.constant 0 : index
    %c0_4 = arith.constant 0 : index
    %4 = vector.load %arg3[%c0_3, %c0_4] : memref<256x256xbf16, #tpu.memory_space<vmem>>, vector<256x256xbf16>
    %cst = arith.constant dense<0.000000e+00> : vector<96x256xf32>
    %5 = tpu.matmul %1, %4, %cst {dimension_numbers = #tpu.dot_dimension_numbers<[1], [0], [0], [1], [0, 0, 1, 1], [], []>} : vector<96x256xbf16>, vector<256x256xbf16>, vector<96x256xf32> -> vector<96x256xf32>
    %c0_5 = arith.constant 0 : index
    %c0_6 = arith.constant 0 : index
    %6 = vector.load %arg4[%c0_5, %c0_6] : memref<128x256xbf16, #tpu.memory_space<vmem>>, vector<128x256xbf16>
    %cst_7 = arith.constant dense<0.000000e+00> : vector<96x256xf32>
    %7 = tpu.matmul %3, %6, %cst_7 {dimension_numbers = #tpu.dot_dimension_numbers<[1], [0], [0], [1], [0, 0, 1, 1], [], []>} : vector<96x128xbf16>, vector<128x256xbf16>, vector<96x256xf32> -> vector<96x256xf32>
    %8 = arith.addf %5, %7 : vector<96x256xf32>
    %c0_8 = arith.constant 0 : index
    %c0_9 = arith.constant 0 : index
    %9 = vector.load %arg5[%c0_8, %c0_9] : memref<1x256xf32, #tpu.memory_space<vmem>>, vector<1x256xf32>
    %10 = vector.broadcast %9 : vector<1x256xf32> to vector<96x256xf32>
    %11 = arith.addf %8, %10 : vector<96x256xf32>
    %12 = arith.mulf %11, %11 : vector<96x256xf32>
    %13 = arith.mulf %11, %12 : vector<96x256xf32>
    %cst_10 = arith.constant 4.471500e-02 : f32
    %14 = vector.broadcast %cst_10 : f32 to vector<96x256xf32>
    %15 = arith.mulf %14, %13 : vector<96x256xf32>
    %16 = arith.addf %11, %15 : vector<96x256xf32>
    %cst_11 = arith.constant 0.797884583 : f32
    %17 = vector.broadcast %cst_11 : f32 to vector<96x256xf32>
    %18 = arith.mulf %17, %16 : vector<96x256xf32>
    %19 = math.tanh %18 : vector<96x256xf32>
    %cst_12 = arith.constant 1.000000e+00 : f32
    %20 = vector.broadcast %cst_12 : f32 to vector<96x256xf32>
    %21 = arith.addf %20, %19 : vector<96x256xf32>
    %cst_13 = arith.constant 5.000000e-01 : f32
    %22 = vector.broadcast %cst_13 : f32 to vector<96x256xf32>
    %23 = arith.mulf %22, %21 : vector<96x256xf32>
    %24 = arith.mulf %11, %23 : vector<96x256xf32>
    %25 = arith.truncf %24 : vector<96x256xf32> to vector<96x256xbf16>
    %c0_14 = arith.constant 0 : index
    %c0_15 = arith.constant 0 : index
    %26 = vector.load %arg6[%c0_14, %c0_15] : memref<256x256xbf16, #tpu.memory_space<vmem>>, vector<256x256xbf16>
    %cst_16 = arith.constant dense<0.000000e+00> : vector<96x256xf32>
    %27 = tpu.matmul %25, %26, %cst_16 {dimension_numbers = #tpu.dot_dimension_numbers<[1], [0], [0], [1], [0, 0, 1, 1], [], []>} : vector<96x256xbf16>, vector<256x256xbf16>, vector<96x256xf32> -> vector<96x256xf32>
    %c0_17 = arith.constant 0 : index
    %c0_18 = arith.constant 0 : index
    %28 = vector.load %arg7[%c0_17, %c0_18] : memref<128x256xbf16, #tpu.memory_space<vmem>>, vector<128x256xbf16>
    %cst_19 = arith.constant dense<0.000000e+00> : vector<96x256xf32>
    %29 = tpu.matmul %3, %28, %cst_19 {dimension_numbers = #tpu.dot_dimension_numbers<[1], [0], [0], [1], [0, 0, 1, 1], [], []>} : vector<96x128xbf16>, vector<128x256xbf16>, vector<96x256xf32> -> vector<96x256xf32>
    %30 = arith.addf %27, %29 : vector<96x256xf32>
    %c0_20 = arith.constant 0 : index
    %c0_21 = arith.constant 0 : index
    %31 = vector.load %arg8[%c0_20, %c0_21] : memref<1x256xf32, #tpu.memory_space<vmem>>, vector<1x256xf32>
    %32 = vector.broadcast %31 : vector<1x256xf32> to vector<96x256xf32>
    %33 = arith.addf %30, %32 : vector<96x256xf32>
    %c0_22 = arith.constant 0 : index
    %c0_23 = arith.constant 0 : index
    %34 = vector.load %arg9[%c0_22, %c0_23] : memref<96x256xf32, #tpu.memory_space<vmem>>, vector<96x256xf32>
    tpu.vector_store %arg9[%c0_22, %c0_23], %33 {strides = array<i32>} : memref<96x256xf32, #tpu.memory_space<vmem>>, vector<96x256xf32>,
    return
  }
  func.func @transform_0(%arg0: i32) -> (i32, i32) {
    %c0_i32 = arith.constant 0 : i32
    %c0_i32_0 = arith.constant 0 : i32
    return %arg0, %c0_i32 : i32, i32
  }
  func.func @transform_1(%arg0: i32) -> (i32, i32) {
    %c0_i32 = arith.constant 0 : i32
    %c0_i32_0 = arith.constant 0 : i32
    return %arg0, %c0_i32 : i32, i32
  }
  func.func @transform_2(%arg0: i32) -> (i32, i32) {
    %c0_i32 = arith.constant 0 : i32
    %c0_i32_0 = arith.constant 0 : i32
    %c0_i32_1 = arith.constant 0 : i32
    return %c0_i32, %c0_i32_0 : i32, i32
  }
  func.func @transform_3(%arg0: i32) -> (i32, i32) {
    %c0_i32 = arith.constant 0 : i32
    %c0_i32_0 = arith.constant 0 : i32
    %c0_i32_1 = arith.constant 0 : i32
    return %c0_i32, %c0_i32_0 : i32, i32
  }
  func.func @transform_4(%arg0: i32) -> (i32, i32) {
    %c0_i32 = arith.constant 0 : i32
    %c0_i32_0 = arith.constant 0 : i32
    %c0_i32_1 = arith.constant 0 : i32
    return %c0_i32, %c0_i32_0 : i32, i32
  }
  func.func @transform_5(%arg0: i32) -> (i32, i32) {
    %c0_i32 = arith.constant 0 : i32
    %c0_i32_0 = arith.constant 0 : i32
    %c0_i32_1 = arith.constant 0 : i32
    return %c0_i32, %c0_i32_0 : i32, i32
  }
  func.func @transform_6(%arg0: i32) -> (i32, i32) {
    %c0_i32 = arith.constant 0 : i32
    %c0_i32_0 = arith.constant 0 : i32
    %c0_i32_1 = arith.constant 0 : i32
    return %c0_i32, %c0_i32_0 : i32, i32
  }
  func.func @transform_7(%arg0: i32) -> (i32, i32) {
    %c0_i32 = arith.constant 0 : i32
    %c0_i32_0 = arith.constant 0 : i32
    %c0_i32_1 = arith.constant 0 : i32
    return %c0_i32, %c0_i32_0 : i32, i32
  }
  func.func @transform_8(%arg0: i32) -> (i32, i32) {
    %c0_i32 = arith.constant 0 : i32
    %c0_i32_0 = arith.constant 0 : i32
    return %arg0, %c0_i32 : i32, i32
  }
}

</mosaic_0001>

<bundles_post_ra>
// kernel: tpu_custom_call.1
= control target key start
LH: loop header
LB: loop body
LE: loop exit
PB: predicated region body
PF: predicated region fallthrough
CT: control target
= control target key end

     0   :  { %s3360_s0 = inlined_call_operand.hbm [shape: f32[384,256], index: 0, kind: input, shape index: {}]   ;;  %s3361_s1 = inlined_call_operand.hbm [shape: f32[384,128], index: 1, kind: input, shape index: {}]   ;;  %s3362_s2 = inlined_call_operand.hbm [shape: bf16[256,256], index: 2, kind: input, shape index: {}]   ;;  %s3363_s3 = inlined_call_operand.hbm [shape: bf16[128,256], index: 3, kind: input, shape index: {}]   ;;  %s3364_s4 = inlined_call_operand.vmem [shape: f32[1,256], index: 4, kind: input, shape index: {}]   ;;  %s3365_s5 = inlined_call_operand.hbm [shape: bf16[256,256], index: 5, kind: input, shape index: {}]   ;;  %s3366_s6 = inlined_call_operand.hbm [shape: bf16[128,256], index: 6, kind: input, shape index: {}]   ;;  %s3367_s7 = inlined_call_operand.vmem [shape: f32[1,256], index: 7, kind: input, shape index: {}]   ;;  %s3368_s8 = inlined_call_operand.hbm [shape: f32[384,256], index: 8, kind: output, shape index: {}]  }
   0x1   :  { %3374 = sst [smem:[#allocation21_spill]] %s3360_s0 }
   0x2   :  { %3375 = sst [smem:[#allocation22_spill]] %s3362_s2 }
   0x3   :  { %3376 = sst [smem:[#allocation23_spill]] %s3363_s3 }
   0x4   :  { %3377 = sst [smem:[#allocation24_spill]] %s3365_s5 }
   0x5   :  { %3378 = sst [smem:[#allocation25_spill]] %s3366_s6 }
   0x6   :  { %13 = vsyncpa [#allocation3], 0 }
   0x7   :  { %15 = vsyncpa [#allocation3 + $0x1], 0 }
   0x8   :  { %16 = vsyncpa [#allocation6], 0 }
   0x9   :  { %18 = vsyncpa [#allocation6 + $0x1], 0 }
   0xa   :  { %19 = vsyncpa [#allocation9], 0 }
   0xb   :  { %20 = vsyncpa [#allocation12], 0 }
   0xc   :  { %21 = vsyncpa [#allocation4], 0 }
   0xd   :  { %23 = vsyncpa [#allocation4 + $0x1], 0  ;;  %s2652_s27 = smov 0   ;;  %s2654_s28 = smov 0  }
   0xe   :  { %s2656_s29 = smov 0   ;;  %s2658_s30 = smov 0  }
   0xf LB: > { %s2673_s9 = sadd.s32 4294967295, %s2591_s30   ;;  %s1902_s10 = sadd.s32 4294967294, %s2591_s30   ;;  %s2591_s30 = sphi %s2658_s30, %s3407_s30   ;;  %s2587_s29 = sphi %s2656_s29, %s3406_s29   ;;  %s2583_s28 = sphi %s2654_s28, %s3405_s28   ;;  %s2579_s27 = sphi %s2652_s27, %s3404_s27  }
  0x10   : > { %p49_p0 = scmp.ne.s32.totalorder %s2583_s28, %s2579_s27  ;;  %p3369_p1 = scmp.eq.s32.totalorder %s2673_s9, 0 }
  0x11   : > { %p225_p2 = scmp.eq.s32.totalorder %s2673_s9, 3  ;;  %p231_p3 = scmp.eq.s32.totalorder %s1902_s10, 3 }
  0x12   : > { %p2682_p4 = por %p3369_p1, %p49_p0  ;;  %p1903_p5 = scmp.ge.s32.totalorder %s2591_s30, 1 }
  0x13   : > { %p2687_p6 = por %p231_p3, %p49_p0  ;;  %p238_p7 = scmp.lt.s32.totalorder %s2591_s30, 5 }
  0x14   : > { %s3379_s11 = scalar_select %p2682_p4, 1, 0 }
  0x15   : > { %s3380_s12 = scalar_select %p2687_p6, 1, 0 }
  0x16   : > { %p2692_p8 = pnand %p1903_p5, %p238_p7  ;;  %s2593_s14 = smov [#allocation7]  }
  0x17   : > { %s250_s15 = sshll.u32 %s2593_s14, 4  ;;  %s2594_s17 = smov [#allocation8]   ;;  %s251_s15 = int_to_ptr.vmem [resolvable:$true] %s250_s15 }
  0x18   : > { %p2082_p9 = pneg %p2692_p8  ;;  %s263_s18 = sshll.u32 %s2594_s17, 4  ;;  %s264_s18 = int_to_ptr.vmem [resolvable:$true] %s263_s18 }
  0x19   : > { %s2595_s19 = smov [#allocation10]   ;;  %s2362_s21 = scalar_lea.vmem %s251_s15, 4096 }
  0x1a   : > { %p2700_p10 = pnand %p2082_p9, %p3369_p1  ;;  %s279_s20 = sshll.u32 %s2595_s19, 4  ;;  %s280_s20 = int_to_ptr.vmem [resolvable:$true] %s279_s20 }
  0x1b   : > { %p2363_p12 = scmp.ne.s32.totalorder %s251_s15, %s2362_s21  ;;  %p2370_p3 = scmp.lt.s32.totalorder %s251_s15, %s251_s15 }
  0x1c   : > { %p2353_p11 = pneg %p2700_p10  ;;  %p2371_p5 = scmp.lt.s32.totalorder %s2362_s21, %s2362_s21 }
  0x1e   : > { %p2365_p13 = pnand %p2363_p12, %p2353_p11  ;;  %p2372_p7 = por %p2371_p5, %p2370_p3 }
  0x20   : > { %p2366_p0 = pneg %p2365_p13 }
  0x22   : > { %p2373_p9 = pnand %p2372_p7, %p2366_p0 }
  0x24   : > { %2376 = shalt.err (!%p2373_p9)
}
  0x25   : > { %s3370_s22 = smov 128   ;;  %s3371_s23 = smov 8  }
  0x26   : > { %s3383_s2 = sld [smem:[#allocation22_spill]]  ;;  %s2388_s26 = scalar_lea.vmem %s264_s18, 2048 }
  0x27   : > { %p2389_p12 = scmp.ne.s32.totalorder %s264_s18, %s2388_s26  ;;  %p2396_p0 = scmp.lt.s32.totalorder %s264_s18, %s264_s18 }
  0x28   : > { %p2397_p5 = scmp.lt.s32.totalorder %s2388_s26, %s2388_s26 }
  0x29   : > { %p2391_p13 = pnand %p2389_p12, %p2353_p11 }
  0x2a   : > { %p2398_p7 = por %p2397_p5, %p2396_p0 }
  0x2b   : > { %p2392_p3 = pneg %p2391_p13 }
  0x2c   : > { %2085 = dma.hbm_to_vmem [thread:$0]  (!%p2700_p10), %s3383_s2, 4096, %s251_s15, [#allocation6], %s3370_s22, %s3370_s22, %s3371_s23  }
  0x2d   : > { %p2399_p9 = pnand %p2398_p7, %p2392_p3 }
  0x2f   : > { %2402 = shalt.err (!%p2399_p9)
}
  0x30   : > { %s3384_s3 = sld [smem:[#allocation23_spill]]  ;;  %s2414_s15 = scalar_lea.vmem %s280_s20, 4096 }
  0x31   : > { %p2415_p1 = scmp.ne.s32.totalorder %s280_s20, %s2414_s15  ;;  %p2422_p0 = scmp.lt.s32.totalorder %s280_s20, %s280_s20 }
  0x32   : > { %p2423_p3 = scmp.lt.s32.totalorder %s2414_s15, %s2414_s15 }
  0x33   : > { %p2417_p12 = pnand %p2415_p1, %p2353_p11 }
  0x34   : > { %p2424_p5 = por %p2423_p3, %p2422_p0 }
  0x35   : > { %p2418_p13 = pneg %p2417_p12 }
  0x36   : > { %2088 = dma.hbm_to_vmem [thread:$0]  (!%p2700_p10), %s3384_s3, 2048, %s264_s18, [#allocation9], %s3370_s22, %s3370_s22, %s3371_s23  }
  0x37   : > { %p2425_p7 = pnand %p2424_p5, %p2418_p13 }
  0x39   : > { %2428 = shalt.err (!%p2425_p7)
}
  0x3a   : > { %s3385_s5 = sld [smem:[#allocation24_spill]]  ;;  %s2598_s18 = smov [#allocation11]  }
  0x3b   : > { %s292_s21 = sshll.u32 %s2598_s18, 4  ;;  %s293_s21 = int_to_ptr.vmem [resolvable:$true] %s292_s21 }
  0x3c   : > { %s2440_s24 = scalar_lea.vmem %s293_s21, 2048  ;;  %p2448_p13 = scmp.lt.s32.totalorder %s293_s21, %s293_s21 }
  0x3d   : > { %p2441_p1 = scmp.ne.s32.totalorder %s293_s21, %s2440_s24  ;;  %p2449_p0 = scmp.lt.s32.totalorder %s2440_s24, %s2440_s24 }
  0x3f   : > { %p2443_p9 = pnand %p2441_p1, %p2353_p11  ;;  %p2450_p3 = por %p2449_p0, %p2448_p13 }
  0x40   : > { %2091 = dma.hbm_to_vmem [thread:$0]  (!%p2700_p10), %s3385_s5, 4096, %s280_s20, [#allocation9], %s3370_s22, %s3370_s22, %s3371_s23  }
  0x41   : > { %p2444_p12 = pneg %p2443_p9 }
  0x43   : > { %p2451_p5 = pnand %p2450_p3, %p2444_p12 }
  0x45   : > { %2454 = shalt.err (!%p2451_p5)
}
  0x46   : > { %s3386_s6 = sld [smem:[#allocation25_spill]]  ;;  %s2751_s26 = sadd.s32 1, %s2591_s30  }
  0x47   : > { %s36_s16 = sadd.s32 1, %s2587_s29  ;;  %s33_s10 = ssub.s32 %s2591_s30, %s2751_s26 }
  0x48   : > { %p43_p11 = scmp.ne.s32.totalorder %s2587_s29, %s2583_s28  ;;  %p34_p7 = scmp.eq.s32.totalorder %s33_s10, 0 }
  0x49   : > { %p44_p1 = scmp.eq.s32.totalorder %s2591_s30, 0  ;;  %p2110_p12 = scmp.lt.s32.totalorder %s2591_s30, 4 }
  0x4a   : > { %p2761_p9 = por %p225_p2, %p43_p11  ;;  %s2770_s17 = sand.u32 1, %s2587_s29  }
  0x4b   : > { %s2767_s15 = scalar_select %p34_p7, %s2587_s29, %s36_s16  }
  0x4c   : > { %2094 = dma.hbm_to_vmem [thread:$0]  (!%p2700_p10), %s3386_s6, 2048, %s293_s21, [#allocation12], %s3370_s22, %s3370_s22, %s3371_s23  }
  0x4d   : > { %s3387_s14 = scalar_select %p2761_p9, 1, 0 }
  0x4e   : > { %3388 = sst [smem:[#allocation20_spill]] %s2767_s15  ;;  %p45_p13 = por %p44_p1, %p43_p11 }
  0x4f   : > { %s2056_s19 = smul.u32 192, %s2770_s17  ;;  %s3390_s0 = sld [smem:[#allocation21_spill]] }
  0x50   : > { %s2022_s18 = smul.u32 3072, %s2591_s30  ;;  %p2774_p10 = pnand %p2110_p12, %p45_p13 }
  0x51   : > { %s313_s16 = scalar_lea.vmem [#allocation2], %s2056_s19  ;;  %s310_s23 = scalar_lea.sflag [#allocation3], %s2770_s17 }
  0x52   : > { %s321_s10 = sshll.u32 %s313_s16, 4  ;;  %p2457_p0 = pneg %p2774_p10  ;;  %s2783_s10 = int_to_ptr.vmem [resolvable:$true] %s321_s10 }
  0x55   : > { %s2781_s25 = scalar_lea.hbm %s3390_s0, %s2022_s18  ;;  %s2460_s20 = scalar_lea.hbm %s3390_s0, 12288 }
  0x56   : > { %s2455_s2 = scalar_lea.hbm %s2781_s25, 3072  ;;  %p2461_p11 = scmp.lt.s32.totalorder %s2781_s25, %s3390_s0 }
  0x57   : > { %p2456_p2 = scmp.ne.s32.totalorder %s2781_s25, %s2455_s2  ;;  %p2462_p7 = scmp.lt.s32.totalorder %s2460_s20, %s2455_s2 }
  0x59   : > { %p2458_p3 = pnand %p2457_p0, %p2456_p2  ;;  %p2463_p1 = por %p2462_p7, %p2461_p11 }
  0x5b   : > { %p2459_p5 = pneg %p2458_p3 }
  0x5d   : > { %p2464_p12 = pnand %p2463_p1, %p2459_p5 }
  0x5f   : > { %2467 = shalt.err (!%p2464_p12)
}
  0x60   : > { %s2468_s19 = scalar_lea.vmem %s2783_s10, 3072  ;;  %s2599_s16 = smov [#allocation2]  }
  0x61   : > { %p2469_p13 = scmp.ne.s32.totalorder %s2783_s10, %s2468_s19  ;;  %s2473_s24 = sshll.u32 %s2599_s16, 4  ;;  %s2474_s24 = int_to_ptr.vmem [resolvable:$false] %s2473_s24 }
  0x62   : > { %s2475_s18 = scalar_lea.vmem %s2474_s24, 6144  ;;  %p2476_p6 = scmp.lt.s32.totalorder %s2783_s10, %s2474_s24 }
  0x63   : > { %p2471_p2 = pnand %p2469_p13, %p2457_p0  ;;  %p2477_p9 = scmp.lt.s32.totalorder %s2475_s18, %s2468_s19 }
  0x65   : > { %p2472_p3 = pneg %p2471_p2  ;;  %p2478_p4 = por %p2477_p9, %p2476_p6 }
  0x67   : > { %p2479_p11 = pnand %p2478_p4, %p2472_p3 }
  0x69   : > { %2482 = shalt.err (!%p2479_p11)
}
  0x6a   : > { %s2600_s2 = smov 256   ;;  %s2601_s3 = smov 16  }
  0x6b   : > { %2098 = dma.hbm_to_vmem [thread:$0]  (!%p2774_p10), %s2781_s25, 3072, %s2783_s10, %s310_s23, %s2600_s2, %s2600_s2, %s2601_s3  }
  0x6c   : > { %s2057_s5 = smul.u32 96, %s2770_s17  ;;  %s3391_s0 = sand.u32 1, %s2591_s30  }
  0x6d   : > { %s2019_s20 = smul.u32 1536, %s2591_s30  ;;  %s332_s6 = scalar_lea.sflag [#allocation6], %s3391_s0 }
  0x6e   : > { %s335_s18 = scalar_lea.vmem [#allocation5], %s2057_s5  ;;  %s2488_s25 = scalar_lea.hbm %s3361_s1, 6144 }
  0x6f   : > { %s2818_s24 = scalar_lea.hbm %s3361_s1, %s2019_s20  ;;  %s342_s22 = sshll.u32 %s335_s18, 4  ;;  %s2820_s22 = int_to_ptr.vmem [resolvable:$true] %s342_s22 }
  0x70   : > { %s2483_s15 = scalar_lea.hbm %s2818_s24, 1536  ;;  %p2489_p5 = scmp.lt.s32.totalorder %s2818_s24, %s3361_s1 }
  0x71   : > { %p2484_p4 = scmp.ne.s32.totalorder %s2818_s24, %s2483_s15  ;;  %p2490_p7 = scmp.lt.s32.totalorder %s2488_s25, %s2483_s15 }
  0x73   : > { %p2486_p6 = pnand %p2484_p4, %p2457_p0  ;;  %p2491_p1 = por %p2490_p7, %p2489_p5 }
  0x75   : > { %p2487_p9 = pneg %p2486_p6 }
  0x77   : > { %p2492_p12 = pnand %p2491_p1, %p2487_p9 }
  0x79   : > { %2495 = shalt.err (!%p2492_p12)
}
  0x7a   : > { %s2496_s0 = scalar_lea.vmem %s2820_s22, 1536  ;;  %s2602_s3 = smov [#allocation5]  }
  0x7b   : > { %p2497_p13 = scmp.ne.s32.totalorder %s2820_s22, %s2496_s0  ;;  %s2501_s5 = sshll.u32 %s2602_s3, 4  ;;  %s2502_s5 = int_to_ptr.vmem [resolvable:$false] %s2501_s5 }
  0x7c   : > { %s2503_s20 = scalar_lea.vmem %s2502_s5, 3072  ;;  %p2504_p11 = scmp.lt.s32.totalorder %s2820_s22, %s2502_s5 }
  0x7d   : > { %p2499_p2 = pnand %p2497_p13, %p2457_p0  ;;  %p2505_p4 = scmp.lt.s32.totalorder %s2503_s20, %s2496_s0 }
  0x7f   : > { %p2500_p3 = pneg %p2499_p2  ;;  %p2506_p6 = por %p2505_p4, %p2504_p11 }
  0x81   : > { %p2507_p5 = pnand %p2506_p6, %p2500_p3 }
  0x83   : > { %2510 = shalt.err (!%p2507_p5)
}
  0x84   : > { %s3392_s15 = smov 8   ;;  %s3393_s16 = smov 128  }
  0x85   : > { %2101 = dma.hbm_to_vmem [thread:$0]  (!%p2774_p10), %s2818_s24, 1536, %s2820_s22, %s332_s6, %s3393_s16, %s3393_s16, %s3392_s15  }
  0x86   : > { %354 = sbr.rel (%p2692_p8) target bundleno = 723 (0x2d3), region = 52  ;;  %s2852_s19 = sand.u32 (!%p2692_p8), 1, %s2583_s28  }
  0x87   : > { %s2058_s18 = smul.u32 (!%p2692_p8), 192, %s2852_s19  ;;  %s357_s23 = scalar_lea.sflag (!%p2692_p8), [#allocation3], %s2852_s19 }
  0x88   : > { %p3394_p0 = scmp.ne.s32.totalorder (!%p2692_p8), %s3379_s11, 0 }
  0x89   : > { %s2858_s21 = scalar_lea.vmem (!%p2692_p8), [#allocation2], %s2058_s18 }
  0x8b   : > { %2554 = dma.done.wait (%p3394_p0), %s357_s23, 3072  }
  0x8c   : > { %2556 = vsyncadd (%p3394_p0), %s357_s23, 4294964224  ;;  %s365_s6 = sand.u32 1, %s2673_s9   ;;  %s2059_s13 = smul.u32 96, %s2852_s19 }
  0x8d   : > { %s366_s22 = scalar_lea.sflag [#allocation6], %s365_s6 }
  0x8e   : > { %s2866_s24 = scalar_lea.vmem [#allocation5], %s2059_s13 }
  0x8f   : > { %2558 = dma.done.wait (%p3394_p0), %s366_s22, 1536  }
  0x90   : > { %2560 = vsyncadd (%p3394_p0), %s366_s22, 4294965760  ;;  %p3395_p8 = scmp.eq.s32.totalorder %s2673_s9, 0 }
  0x92   : > { %2562 = dma.done.wait (%p3395_p8), [#allocation6], 4096   ;;  %p3396_p10 = pmov %p3395_p8 }
  0x93   : > { %p3397_p9 = pmov %p3395_p8 }
  0x94   : > { %2564 = vsyncadd (%p3396_p10), [#allocation6], 4294963200 }
  0x95   : > { %2566 = dma.done.wait (%p3397_p9), [#allocation9], 6144   ;;  %p3398_p7 = pmov %p3395_p8 }
  0x97   : > { %2568 = vsyncadd (%p3398_p7), [#allocation9], 4294961152  ;;  %p3399_p1 = pmov %p3398_p7 }
  0x99   : > { %2570 = dma.done.wait (%p3399_p1), [#allocation12], 2048   ;;  %p3400_p12 = pmov %p3399_p1 }
  0x9a   : > { %v2603_v0 = vmov 0   ;;  %v2159_v1 = vld [vmem:[#allocation7 + $0x74] ss:$8 sps:$4 sm:$0xff]   ;;  %v2161_v2 = vld [vmem:[#allocation7 + $0x70] ss:$8 sps:$4 sm:$0xff]   ;;  %v428_v33 = vld [vmem:[%s2858_s21 + $0x8] sm:$0xff] }
  0x9b   : > { %2572 = vsyncadd (%p3400_p12), [#allocation12], 4294965248  ;;  %641 = vmatprep.mubr.bf16.mxu0 %v2603_v0  ;;  %862 = vmatprep.subr.bf16.mxu1 %v2159_v1  ;;  %v2162_v3 = vld [vmem:[#allocation7 + $0x64] ss:$8 sps:$4 sm:$0xff]   ;;  %v2164_v4 = vld [vmem:[#allocation7 + $0x60] ss:$8 sps:$4 sm:$0xff]  }
  0x9c   : > { %863 = vmatpush1.bf16.msra.mxu1 %v2161_v2  ;;  %v2165_v5 = vld [vmem:[#allocation7 + $0x54] ss:$8 sps:$4 sm:$0xff]   ;;  %v2167_v6 = vld [vmem:[#allocation7 + $0x50] ss:$8 sps:$4 sm:$0xff]   ;;  %v2168_v7 = vld [vmem:[#allocation7 + $0x44] ss:$8 sps:$4 sm:$0xff]  }
  0x9d   : > { %864 = vmatprep.subr.bf16.mxu1 %v2162_v3  ;;  %v2180_v8 = vld [vmem:[#allocation8 + $0x74] ss:$8 sps:$4 sm:$0xff]   ;;  %v2182_v9 = vld [vmem:[#allocation8 + $0x70] ss:$8 sps:$4 sm:$0xff]   ;;  %v2170_v10 = vld [vmem:[#allocation7 + $0x40] ss:$8 sps:$4 sm:$0xff]  }
  0x9e   : > { %v2171_v11 = vld [vmem:[#allocation7 + $0x34] ss:$8 sps:$4 sm:$0xff]   ;;  %609 = vmatprep.subr.bf16.mxu0 %v2180_v8  ;;  %v2186_v12 = vld [vmem:[#allocation8 + $0x64] ss:$8 sps:$4 sm:$0xff]   ;;  %v2188_v13 = vld [vmem:[#allocation8 + $0x60] ss:$8 sps:$4 sm:$0xff]  }
  0x9f   : > { %610 = vmatpush1.bf16.msra.mxu0 %v2182_v9  ;;  %v2173_v14 = vld [vmem:[#allocation7 + $0x30] ss:$8 sps:$4 sm:$0xff]   ;;  %v2192_v15 = vld [vmem:[#allocation8 + $0x54] ss:$8 sps:$4 sm:$0xff]   ;;  %v2174_v16 = vld [vmem:[#allocation7 + $0x24] ss:$8 sps:$4 sm:$0xff]  }
  0xa0   : > { %865 = vmatpush1.bf16.msra.mxu1 %v2164_v4  ;;  %611 = vmatprep.subr.bf16.mxu0 %v2186_v12  ;;  %v2194_v17 = vld [vmem:[#allocation8 + $0x50] ss:$8 sps:$4 sm:$0xff]   ;;  %v2198_v18 = vld [vmem:[#allocation8 + $0x44] ss:$8 sps:$4 sm:$0xff]   ;;  %v2176_v19 = vld [vmem:[#allocation7 + $0x20] ss:$8 sps:$4 sm:$0xff]  }
  0xa1   : > { %866 = vmatprep.subr.bf16.mxu1 %v2165_v5  ;;  %v2177_v20 = vld [vmem:[#allocation7 + $0x14] ss:$8 sps:$4 sm:$0xff]   ;;  %v2200_v21 = vld [vmem:[#allocation8 + $0x40] ss:$8 sps:$4 sm:$0xff]   ;;  %v2179_v23 = vld [vmem:[#allocation7 + $0x10] ss:$8 sps:$4 sm:$0xff]  }
  0xa2   : > { %v2204_v22 = vld [vmem:[#allocation8 + $0x34] ss:$8 sps:$4 sm:$0xff]   ;;  %v2183_v24 = vld [vmem:[#allocation7 + $0x4] ss:$8 sps:$4 sm:$0xff]   ;;  %v2206_v25 = vld [vmem:[#allocation8 + $0x30] ss:$8 sps:$4 sm:$0xff]  }
  0xa3   : > { %612 = vmatpush1.bf16.msra.mxu0 %v2188_v13  ;;  %v2210_v26 = vld [vmem:[#allocation8 + $0x24] ss:$8 sps:$4 sm:$0xff]   ;;  %v2185_v27 = vld [vmem:[#allocation7] ss:$8 sps:$4 sm:$0xff]   ;;  %v2189_v28 = vld [vmem:[#allocation7 + $0xf4] ss:$8 sps:$4 sm:$0xff]  }
  0xa4   : > { %867 = vmatpush1.bf16.msra.mxu1 %v2167_v6  ;;  %613 = vmatprep.subr.bf16.mxu0 %v2192_v15  ;;  %v2212_v29 = vld [vmem:[#allocation8 + $0x20] ss:$8 sps:$4 sm:$0xff]   ;;  %v2216_v30 = vld [vmem:[#allocation8 + $0x14] ss:$8 sps:$4 sm:$0xff]   ;;  %v2191_v31 = vld [vmem:[#allocation7 + $0xf0] ss:$8 sps:$4 sm:$0xff]  }
  0xa5   : > { %868 = vmatprep.subr.bf16.mxu1 %v2168_v7  ;;  %v2195_v32 = vld [vmem:[#allocation7 + $0xe4] ss:$8 sps:$4 sm:$0xff]   ;;  %v2218_v34 = vld [vmem:[#allocation8 + $0x10] ss:$8 sps:$4 sm:$0xff]   ;;  %v2197_v38 = vld [vmem:[#allocation7 + $0xe0] ss:$8 sps:$4 sm:$0xff]  }
  0xa6   : > { %v430_v35 = vld [vmem:[%s2858_s21 + $0x18] sm:$0xff]  ;;  %v2222_v36 = vld [vmem:[#allocation8 + $0x4] ss:$8 sps:$4 sm:$0xff]   ;;  %v2224_v40 = vld [vmem:[#allocation8] ss:$8 sps:$4 sm:$0xff]   ;;  %s3250_s2 = scalar_lea.vmem [#allocation13], %s2058_s18 }
  0xa7   : > { %614 = vmatpush1.bf16.msra.mxu0 %v2194_v17  ;;  %v452_v37 = vpack.c.bf16 %v430_v35, %v428_v33  ;;  %v2201_v39 = vld [vmem:[#allocation7 + $0xd4] ss:$8 sps:$4 sm:$0xff]   ;;  %v463_v41 = vld [vmem:[%s2866_s24] sm:$0xff]  ;;  %v464_v42 = vld [vmem:[%s2866_s24 + $0x8] sm:$0xff]  ;;  %s2023_s0 = smul.u32 3072, %s2673_s9  ;;  %s1768_s3 = sshll.u32 %s3250_s2, 4  ;;  %s3317_s3 = int_to_ptr.vmem [resolvable:$true] %s1768_s3 }
  0xa8   : > { %869 = vmatpush1.bf16.msra.mxu1 %v2170_v10  ;;  %615 = vmatprep.subr.bf16.mxu0 %v2198_v18  ;;  %v2203_v43 = vld [vmem:[#allocation7 + $0xd0] ss:$8 sps:$4 sm:$0xff]   ;;  %v2207_v44 = vld [vmem:[#allocation7 + $0xc4] ss:$8 sps:$4 sm:$0xff]   ;;  %v2889_v45 = vpack.c.bf16 %v464_v42, %v463_v41  ;;  %v2209_v46 = vld [vmem:[#allocation7 + $0xc0] ss:$8 sps:$4 sm:$0xff]  }
  0xa9   : > { %870 = vmatprep.subr.bf16.mxu1 %v2171_v11  ;;  %894 = vmatprep.mubr.bf16.mxu1 %v452_v37  ;;  %v2213_v47 = vld [vmem:[#allocation7 + $0xb4] ss:$8 sps:$4 sm:$0xff]   ;;  %v2231_v50 = vld [vmem:[#allocation11 + $0x70] ss:$8 sps:$4 sm:$0xff]   ;;  %v2236_v52 = vld [vmem:[#allocation11 + $0x64] ss:$8 sps:$4 sm:$0xff]   ;;  %s3313_s15 = scalar_lea.hbm %s3368_s8, %s2023_s0 }
  0xaa   : > { %v465_v48 = vld [vmem:[%s2866_s24 + $0x10] sm:$0xff]  ;;  %v466_v49 = vld [vmem:[%s2866_s24 + $0x18] sm:$0xff]  ;;  %v2219_v54 = vld [vmem:[#allocation7 + $0xa4] ss:$8 sps:$4 sm:$0xff]   ;;  %s1754_s9 = scalar_lea.sflag [#allocation4], %s2852_s19  ;;  %s2511_s16 = scalar_lea.vmem %s3317_s3, 3072 }
  0xab   : > { %616 = vmatpush1.bf16.msra.mxu0 %v2200_v21  ;;  %v2233_v51 = vld [vmem:[#allocation11 + $0x74] ss:$8 sps:$4 sm:$0xff]   ;;  %v2215_v53 = vld [vmem:[#allocation7 + $0xb0] ss:$8 sps:$4 sm:$0xff]   ;;  %v2895_v55 = vpack.c.bf16 %v466_v49, %v465_v48  ;;  %v2234_v56 = vld [vmem:[#allocation11 + $0x60] ss:$8 sps:$4 sm:$0xff]   ;;  %p2512_p13 = scmp.ne.s32.totalorder %s3317_s3, %s2511_s16 }
  0xac   : > { %871 = vmatpush1.bf16.msra.mxu1 %v2173_v14  ;;  %617 = vmatprep.subr.bf16.mxu0 %v2204_v22  ;;  %v2221_v57 = vld [vmem:[#allocation7 + $0xa0] ss:$8 sps:$4 sm:$0xff]   ;;  %v2239_v58 = vld [vmem:[#allocation11 + $0x54] ss:$8 sps:$4 sm:$0xff]   ;;  %v2237_v62 = vld [vmem:[#allocation11 + $0x50] ss:$8 sps:$4 sm:$0xff]  }
  0xad   : > { %872 = vmatprep.subr.bf16.mxu1 %v2174_v16  ;;  %v2225_v59 = vld [vmem:[#allocation7 + $0x94] ss:$8 sps:$4 sm:$0xff]   ;;  %v467_v60 = vld [vmem:[%s2866_s24 + $0x20] sm:$0xff]  ;;  %v468_v61 = vld [vmem:[%s2866_s24 + $0x28] sm:$0xff]  ;;  %p3401_p2 = scmp.ne.s32.totalorder %s3387_s14, 0  ;;  %s2604_s18 = smov [#allocation13]  }
  0xae   : > { %v2242_v63 = vld [vmem:[#allocation11 + $0x44] ss:$8 sps:$4 sm:$0xff]   ;;  %v2227_v1 = vld [vmem:[#allocation7 + $0x90] ss:$8 sps:$4 sm:$0xff]   ;;  %v2901_v3 = vpack.c.bf16 %v468_v61, %v467_v60  ;;  %v2230_v4 = vld [vmem:[#allocation7 + $0x80] ss:$8 sps:$4 sm:$0xff]  }
  0xaf   : > { %618 = vmatpush1.bf16.msra.mxu0 %v2206_v25  ;;  %v2228_v2 = vld [vmem:[#allocation7 + $0x84] ss:$8 sps:$4 sm:$0xff]   ;;  %v429_v6 = vld [vmem:[%s2858_s21 + $0x10] sm:$0xff]  ;;  %v2240_v7 = vld [vmem:[#allocation11 + $0x40] ss:$8 sps:$4 sm:$0xff]   ;;  %p2513_p3 = pnand %p2512_p13, %p3401_p2  ;;  %s2515_s23 = sshll.u32 %s2604_s18, 4  ;;  %s2516_s23 = int_to_ptr.vmem [resolvable:$false] %s2515_s23 }
  0xb0   : > { %873 = vmatpush1.bf16.msra.mxu1 %v2176_v19  ;;  %619 = vmatprep.subr.bf16.mxu0 %v2210_v26  ;;  %v427_v5 = vld [vmem:[%s2858_s21] sm:$0xff]  ;;  %v432_v8 = vld [vmem:[%s2858_s21 + $0x28] sm:$0xff]  ;;  %v434_v9 = vld [vmem:[%s2858_s21 + $0x38] sm:$0xff]  ;;  %p2518_p4 = scmp.lt.s32.totalorder %s3317_s3, %s2516_s23 }
  0xb1   : > { %874 = vmatprep.subr.bf16.mxu1 %v2177_v20  ;;  %v2245_v10 = vld [vmem:[#allocation11 + $0x34] ss:$8 sps:$4 sm:$0xff]   ;;  %v2243_v13 = vld [vmem:[#allocation11 + $0x30] ss:$8 sps:$4 sm:$0xff]   ;;  %v2248_v14 = vld [vmem:[#allocation11 + $0x24] ss:$8 sps:$4 sm:$0xff]   ;;  %v451_v16 = vpack.c.bf16 %v429_v6, %v427_v5  ;;  %v454_v17 = vpack.c.bf16 %v434_v9, %v432_v8  ;;  %p2514_p11 = pneg %p2513_p3 }
  0xb2   : > { %v469_v11 = vld [vmem:[%s2866_s24 + $0x30] sm:$0xff]  ;;  %v470_v12 = vld [vmem:[%s2866_s24 + $0x38] sm:$0xff]  ;;  %v2246_v18 = vld [vmem:[#allocation11 + $0x20] ss:$8 sps:$4 sm:$0xff]  }
  0xb3   : > { %620 = vmatpush1.bf16.msra.mxu0 %v2212_v29  ;;  %v2257_v15 = vld [vmem:[#allocation10 + $0x74] ss:$8 sps:$4 sm:$0xff]   ;;  %v2911_v19 = vld [vmem:[#allocation10 + $0x70] ss:$8 sps:$4 sm:$0xff]   ;;  %v2913_v20 = vpack.c.bf16 %v470_v12, %v469_v11  ;;  %v2915_v22 = vld [vmem:[#allocation10 + $0x64] ss:$8 sps:$4 sm:$0xff]  }
  0xb4   : > { %875 = vmatpush1.bf16.msra.mxu1 %v2179_v23  ;;  %621 = vmatprep.subr.bf16.mxu0 %v2216_v30  ;;  %v2251_v21 = vld [vmem:[#allocation11 + $0x14] ss:$8 sps:$4 sm:$0xff]   ;;  %v431_v23 = vld [vmem:[%s2858_s21 + $0x20] sm:$0xff]  ;;  %v436_v25 = vld [vmem:[%s2858_s21 + $0x48] sm:$0xff] }
  0xb5   : > { %876 = vmatprep.subr.bf16.mxu1 %v2183_v24  ;;  %v433_v24 = vld [vmem:[%s2858_s21 + $0x30] sm:$0xff]  ;;  %v438_v26 = vld [vmem:[%s2858_s21 + $0x58] sm:$0xff]  ;;  %v2258_v30 = vld [vmem:[#allocation10 + $0x60] ss:$8 sps:$4 sm:$0xff]  }
  0xb6   : > { %v2249_v29 = vld [vmem:[#allocation11 + $0x10] ss:$8 sps:$4 sm:$0xff]   ;;  %v2263_v33 = vld [vmem:[#allocation10 + $0x54] ss:$8 sps:$4 sm:$0xff]   ;;  %v440_v41 = vld [vmem:[%s2858_s21 + $0x68] sm:$0xff] }
  0xb7   : > { %622 = vmatpush1.bf16.msra.mxu0 %v2218_v34  ;;  %v456_v34 = vpack.c.bf16 %v438_v26, %v436_v25  ;;  %v2261_v37 = vld [vmem:[#allocation10 + $0x50] ss:$8 sps:$4 sm:$0xff]   ;;  %v2270_v5 = vld [vmem:[#allocation10 + $0x20] ss:$8 sps:$4 sm:$0xff]   ;;  %v2287_v12 = vld [vmem:[#allocation10 + $0xd4] ss:$8 sps:$4 sm:$0xff]  }
  0xb8   : > { %877 = vmatpush1.bf16.msra.mxu1 %v2185_v27  ;;  %623 = vmatprep.subr.bf16.mxu0 %v2222_v36  ;;  %v471_v27 = vld [vmem:[%s2866_s24 + $0x40] sm:$0xff]  ;;  %v442_v42 = vld [vmem:[%s2858_s21 + $0x78] sm:$0xff] }
  0xb9   : > { %878 = vmatprep.subr.bf16.mxu1 %v2189_v28  ;;  %v472_v28 = vld [vmem:[%s2866_s24 + $0x48] sm:$0xff]  ;;  %v458_v48 = vpack.c.bf16 %v442_v42, %v440_v41  ;;  %v450_v60 = vld [vmem:[%s2858_s21 + $0xb8] sm:$0xff] }
  0xba   : > { %v2927_v35 = vpack.c.bf16 %v472_v28, %v471_v27  ;;  %v2252_v36 = vld [vmem:[#allocation11] ss:$8 sps:$4 sm:$0xff]   ;;  %v2273_v6 = vld [vmem:[#allocation10 + $0x10] ss:$8 sps:$4 sm:$0xff]  }
  0xbb   : > { %624 = vmatpush1.bf16.msra.mxu0 %v2224_v40  ;;  %v437_v40 = vld [vmem:[%s2858_s21 + $0x50] sm:$0xff]  ;;  %v2276_v8 = vld [vmem:[#allocation10] ss:$8 sps:$4 sm:$0xff]  }
  0xbc   : > { %879 = vmatpush2.bf16.msra.mxu1 %v2191_v31  ;;  %1347 = vmatprep.subr.bf16.mxu0 %v2233_v51  ;;  %v453_v31 = vpack.c.bf16 %v433_v24, %v431_v23  ;;  %v441_v51 = vld [vmem:[%s2858_s21 + $0x70] sm:$0xff]  ;;  %v2282_v11 = vld [vmem:[#allocation10 + $0xe0] ss:$8 sps:$4 sm:$0xff]  }
  0xbd   : > { %880 = vmatprep.subr.bf16.mxu1 %v2195_v32  ;;  %v2254_v32 = vld [vmem:[#allocation11 + $0x4] ss:$8 sps:$4 sm:$0xff]   ;;  %v2279_v9 = vld [vmem:[#allocation10 + $0xf0] ss:$8 sps:$4 sm:$0xff]   ;;  %v2300_v23 = vld [vmem:[#allocation10 + $0x80] ss:$8 sps:$4 sm:$0xff]  }
  0xbe   : > { %642 = vmatmul.mubr.bf16.vlgmr.msra.gmra.mxu0 %v2889_v45 }
  0xbf   : > { %651 = vmatprep.mubr.bf16.mxu0 %v2603_v0  ;;  %1348 = vmatpush1.bf16.msra.mxu0 %v2231_v50  ;;  %v439_v50 = vld [vmem:[%s2858_s21 + $0x60] sm:$0xff] }
  0xc0   : > { %881 = vmatpush2.bf16.msra.mxu1 %v2197_v38  ;;  %1349 = vmatprep.subr.bf16.mxu0 %v2236_v52  ;;  %v2266_v38 = vld [vmem:[#allocation10 + $0x44] ss:$8 sps:$4 sm:$0xff]  }
  0xc1   : > { %882 = vmatprep.subr.bf16.mxu1 %v2201_v39  ;;  %v435_v39 = vld [vmem:[%s2858_s21 + $0x40] sm:$0xff]  ;;  %v444_v52 = vld [vmem:[%s2858_s21 + $0x88] sm:$0xff] }
  0xc3   : > { %1350 = vmatpush1.bf16.msra.mxu0 %v2234_v56 }
  0xc4   : > { %883 = vmatpush2.bf16.msra.mxu1 %v2203_v43  ;;  %1351 = vmatprep.subr.bf16.mxu0 %v2239_v58  ;;  %v473_v43 = vld [vmem:[%s2866_s24 + $0x50] sm:$0xff] }
  0xc5   : > { %884 = vmatprep.subr.bf16.mxu1 %v2207_v44  ;;  %v474_v44 = vld [vmem:[%s2866_s24 + $0x58] sm:$0xff]  ;;  %v445_v58 = vld [vmem:[%s2858_s21 + $0x90] sm:$0xff] }
  0xc6   : > { %652 = vmatmul.mubr.bf16.gmra.mxu0 %v2895_v55  ;;  %v480_v49 = vpack.c.bf16 %v474_v44, %v473_v43 }
  0xc7   : > { %661 = vmatprep.mubr.bf16.mxu0 %v2603_v0  ;;  %1352 = vmatpush1.bf16.msra.mxu0 %v2237_v62 }
  0xc8   : > { %885 = vmatpush2.bf16.msra.mxu1 %v2209_v46  ;;  %1353 = vmatprep.subr.bf16.mxu0 %v2242_v63  ;;  %v2264_v46 = vld [vmem:[#allocation10 + $0x40] ss:$8 sps:$4 sm:$0xff]  }
  0xc9   : > { %886 = vmatprep.subr.bf16.mxu1 %v2213_v47  ;;  %v455_v47 = vpack.c.bf16 %v437_v40, %v435_v39  ;;  %v447_v63 = vld [vmem:[%s2858_s21 + $0xa0] sm:$0xff] }
  0xcb   : > { %1354 = vmatpush1.bf16.msra.mxu0 %v2240_v7  ;;  %v2278_v7 = vld [vmem:[#allocation10 + $0x4] ss:$8 sps:$4 sm:$0xff]  }
  0xcc   : > { %887 = vmatpush2.bf16.msra.mxu1 %v2215_v53  ;;  %1355 = vmatprep.subr.bf16.mxu0 %v2245_v10  ;;  %v446_v53 = vld [vmem:[%s2858_s21 + $0x98] sm:$0xff]  ;;  %v2284_v10 = vld [vmem:[#allocation10 + $0xe4] ss:$8 sps:$4 sm:$0xff]  }
  0xcd   : > { %888 = vmatprep.subr.bf16.mxu1 %v2219_v54  ;;  %v457_v54 = vpack.c.bf16 %v441_v51, %v439_v50  ;;  %v460_v56 = vpack.c.bf16 %v446_v53, %v444_v52 }
  0xce   : > { %662 = vmatmul.mubr.bf16.gmra.mxu0 %v2901_v3 }
  0xcf   : > { %671 = vmatprep.mubr.bf16.mxu0 %v2603_v0  ;;  %1356 = vmatpush1.bf16.msra.mxu0 %v2243_v13  ;;  %v2285_v13 = vld [vmem:[#allocation10 + $0xd0] ss:$8 sps:$4 sm:$0xff]  }
  0xd0   : > { %889 = vmatpush2.bf16.msra.mxu1 %v2221_v57  ;;  %1357 = vmatprep.subr.bf16.mxu0 %v2248_v14  ;;  %v443_v57 = vld [vmem:[%s2858_s21 + $0x80] sm:$0xff] }
  0xd1   : > { %890 = vmatprep.subr.bf16.mxu1 %v2225_v59  ;;  %v448_v59 = vld [vmem:[%s2858_s21 + $0xa8] sm:$0xff]  ;;  %v459_v61 = vpack.c.bf16 %v445_v58, %v443_v57 }
  0xd2   : > { %v462_v62 = vpack.c.bf16 %v450_v60, %v448_v59  ;;  %v2290_v14 = vld [vmem:[#allocation10 + $0xc4] ss:$8 sps:$4 sm:$0xff]  }
  0xd3   : > { %1358 = vmatpush1.bf16.msra.mxu0 %v2246_v18  ;;  %v2296_v18 = vld [vmem:[#allocation10 + $0xa4] ss:$8 sps:$4 sm:$0xff]  }
  0xd4   : > { %891 = vmatpush2.bf16.msra.mxu1 %v2227_v1  ;;  %1359 = vmatprep.subr.bf16.mxu0 %v2251_v21  ;;  %v449_v1 = vld [vmem:[%s2858_s21 + $0xb0] sm:$0xff]  ;;  %s2517_s21 = scalar_lea.vmem %s2516_s23, 6144 }
  0xd5   : > { %892 = vmatprep.subr.bf16.mxu1 %v2228_v2  ;;  %v2267_v2 = vld [vmem:[#allocation10 + $0x30] ss:$8 sps:$4 sm:$0xff]   ;;  %p2519_p6 = scmp.lt.s32.totalorder %s2517_s21, %s2511_s16 }
  0xd6   : > { %672 = vmatmul.mubr.bf16.gmra.mxu0 %v2913_v20  ;;  %v2297_v21 = vld [vmem:[#allocation10 + $0x90] ss:$8 sps:$4 sm:$0xff]  }
  0xd7   : > { %681 = vmatprep.mubr.bf16.mxu0 %v2603_v0  ;;  %1360 = vmatpush1.bf16.msra.mxu0 %v2249_v29  ;;  %v957_v29 = vlaneseq  ;;  %p2520_p5 = por %p2519_p6, %p2518_p4 }
  0xd8   : > { %893 = vmatpush2.bf16.msra.mxu1 %v2230_v4  ;;  %1361 = vmatprep.subr.bf16.mxu0 %v2254_v32  ;;  %v2269_v4 = vld [vmem:[#allocation10 + $0x34] ss:$8 sps:$4 sm:$0xff]  }
  0xd9   : > { %2024 = vmatprep.subr.bf16.mxu1 %v2257_v15  ;;  %v2960_v32 = vshrl.u32 %v957_v29, 7  ;;  %p2521_p0 = pnand %p2520_p5, %p2514_p11 }
  0xdb   : > { %895 = vmatmul.mubr.bf16.vlgmr.msra.gmra.mxu1 %v451_v16  ;;  %1362 = vmatpush1.bf16.msra.mxu0 %v2252_v36  ;;  %v2293_v16 = vld [vmem:[#allocation10 + $0xb4] ss:$8 sps:$4 sm:$0xff]   ;;  %v955_v36 = vld [vmem:[%s3364_s4] sm:$0x3] }
  0xdc   : > { %904 = vmatprep.mubr.bf16.mxu1 %v454_v17  ;;  %2040 = vmatpush1.bf16.msra.mxu1 %v2911_v19  ;;  %v2291_v17 = vld [vmem:[#allocation10 + $0xb0] ss:$8 sps:$4 sm:$0xff]  }
  0xdd   : > { %2025 = vmatprep.subr.bf16.mxu1 %v2915_v22  ;;  %1600 = vmatprep.subr.bf16.mxu0 %v2257_v15  ;;  %v2288_v15 = vld [vmem:[#allocation10 + $0xc0] ss:$8 sps:$4 sm:$0xff]  }
  0xde   : > { %682 = vmatmul.mubr.bf16.gmra.mxu0 %v2927_v35 }
  0xdf   : > { %691 = vmatprep.mubr.bf16.mxu0 %v2603_v0 }
  0xe0   : > { %2041 = vmatpush1.bf16.msra.mxu1 %v2258_v30 }
  0xe1   : > { %2026 = vmatprep.subr.bf16.mxu1 %v2263_v33 }
  0xe3   : > { %905 = vmatmul.mubr.bf16.gmra.mxu1 %v453_v31 }
  0xe4   : > { %914 = vmatprep.mubr.bf16.mxu1 %v456_v34  ;;  %2042 = vmatpush1.bf16.msra.mxu1 %v2261_v37 }
  0xe5   : > { %2027 = vmatprep.subr.bf16.mxu1 %v2266_v38 }
  0xe6   : > { %692 = vmatmul.mubr.bf16.gmra.mxu0 %v480_v49 }
  0xe7   : > { %1379 = vmatprep.mubr.bf16.mxu0 %v2603_v0 }
  0xe8   : > { %2043 = vmatpush1.bf16.msra.mxu1 %v2264_v46 }
  0xe9   : > { %2028 = vmatprep.subr.bf16.mxu1 %v2269_v4 }
  0xeb   : > { %915 = vmatmul.mubr.bf16.gmra.mxu1 %v455_v47 }
  0xec   : > { %924 = vmatprep.mubr.bf16.mxu1 %v458_v48  ;;  %2044 = vmatpush1.bf16.msra.mxu1 %v2267_v2 }
  0xee   : > { %1380 = vmatmul.mubr.bf16.vlgmr.msra.gmra.mxu0 %v2889_v45  ;;  %v461_v45 = vpack.c.bf16 %v449_v1, %v447_v63 }
  0xef   : > { %1601 = vmatpush1.bf16.msra.mxu0 %v2911_v19  ;;  %1389 = vmatprep.mubr.bf16.mxu0 %v2603_v0  ;;  %v2294_v19 = vld [vmem:[#allocation10 + $0xa0] ss:$8 sps:$4 sm:$0xff]  }
  0xf0   : > { %1602 = vmatprep.subr.bf16.mxu0 %v2915_v22  ;;  %v2302_v22 = vld [vmem:[#allocation10 + $0x84] ss:$8 sps:$4 sm:$0xff]  }
  0xf3   : > { %925 = vmatmul.mubr.bf16.gmra.mxu1 %v457_v54  ;;  %1603 = vmatpush1.bf16.msra.mxu0 %v2258_v30 }
  0xf4   : > { %934 = vmatprep.mubr.bf16.mxu1 %v460_v56  ;;  %1604 = vmatprep.subr.bf16.mxu0 %v2263_v33 }
  0xf6   : > { %1390 = vmatmul.mubr.bf16.gmra.mxu0 %v2895_v55  ;;  %v2272_v55 = vld [vmem:[#allocation10 + $0x24] ss:$8 sps:$4 sm:$0xff]  }
  0xf7   : > { %1605 = vmatpush1.bf16.msra.mxu0 %v2261_v37  ;;  %1399 = vmatprep.mubr.bf16.mxu0 %v2603_v0 }
  0xf8   : > { %1606 = vmatprep.subr.bf16.mxu0 %v2266_v38  ;;  %2029 = vmatprep.subr.bf16.mxu1 %v2272_v55  ;;  %v963_v38 = vsub.s32 1, %v2960_v32 }
  0xf9   : > { %2045 = vmatpush1.bf16.msra.mxu1 %v2270_v5 }
  0xfa   : > { %v2977_v43 = vrot.slane %v955_v36, %v963_v38 }
  0xfb   : > { %935 = vmatmul.mubr.bf16.gmra.mxu1 %v459_v61  ;;  %1607 = vmatpush1.bf16.msra.mxu0 %v2264_v46 }
  0xfc   : > { %944 = vmatprep.mubr.bf16.mxu1 %v462_v62  ;;  %1608 = vmatprep.subr.bf16.mxu0 %v2269_v4 }
  0xfe   : > { %1400 = vmatmul.mubr.bf16.gmra.mxu0 %v2901_v3  ;;  %v2275_v3 = vld [vmem:[#allocation10 + $0x14] ss:$8 sps:$4 sm:$0xff]  }
  0xff   : > { %1409 = vmatprep.mubr.bf16.mxu0 %v2603_v0  ;;  %1609 = vmatpush1.bf16.msra.mxu0 %v2267_v2 }
 0x100   : > { %1610 = vmatprep.subr.bf16.mxu0 %v2272_v55  ;;  %2030 = vmatprep.subr.bf16.mxu1 %v2275_v3 }
 0x101   : > { %2046 = vmatpush1.bf16.msra.mxu1 %v2273_v6 }
 0x102   : > { %2031 = vmatprep.subr.bf16.mxu1 %v2278_v7 }
 0x103   : > { %945 = vmatmul.mubr.bf16.gmra.mxu1 %v461_v45  ;;  %1611 = vmatpush1.bf16.msra.mxu0 %v2270_v5 }
 0x104   : > { %1612 = vmatprep.subr.bf16.mxu0 %v2275_v3 }
 0x105   : > { %2047 = vmatpush1.bf16.msra.mxu1 %v2276_v8 }
 0x106   : > { %1410 = vmatmul.mubr.bf16.gmra.mxu0 %v2913_v20  ;;  %v2299_v20 = vld [vmem:[#allocation10 + $0x94] ss:$8 sps:$4 sm:$0xff]  }
 0x107   : > { %1419 = vmatprep.mubr.bf16.mxu0 %v2603_v0  ;;  %1613 = vmatpush1.bf16.msra.mxu0 %v2273_v6 }
 0x108   : > { %1614 = vmatprep.subr.bf16.mxu0 %v2278_v7 }
 0x10b   : > { %1615 = vmatpush1.bf16.msra.mxu0 %v2276_v8 }
 0x10e   : > { %1420 = vmatmul.mubr.bf16.gmra.mxu0 %v2927_v35  ;;  %v959_v35 = vsub.s32 0, %v2960_v32 }
 0x10f   : > { %1429 = vmatprep.mubr.bf16.mxu0 %v2603_v0  ;;  %v2281_v0 = vld [vmem:[#allocation10 + $0xf4] ss:$8 sps:$4 sm:$0xff]  }
 0x110   : > { %1616 = vmatprep.subr.bf16.mxu0 %v2281_v0  ;;  %2032 = vmatprep.subr.bf16.mxu1 %v2281_v0  ;;  %v2971_v39 = vrot.slane %v955_v36, %v959_v35 }
 0x111   : > { %1617 = vmatpush2.bf16.msra.mxu0 %v2279_v9  ;;  %2048 = vmatpush2.bf16.msra.mxu1 %v2279_v9 }
 0x112   : > { %1618 = vmatprep.subr.bf16.mxu0 %v2284_v10  ;;  %2033 = vmatprep.subr.bf16.mxu1 %v2284_v10 }
 0x115   : > { %1619 = vmatpush2.bf16.msra.mxu0 %v2282_v11  ;;  %2049 = vmatpush2.bf16.msra.mxu1 %v2282_v11 }
 0x116   : > { %1430 = vmatmul.mubr.bf16.gmra.mxu0 %v480_v49  ;;  %1620 = vmatprep.subr.bf16.mxu0 %v2287_v12 }
 0x117   : > { %2034 = vmatprep.subr.bf16.mxu1 %v2287_v12 }
 0x119   : > { %1621 = vmatpush2.bf16.msra.mxu0 %v2285_v13  ;;  %2050 = vmatpush2.bf16.msra.mxu1 %v2285_v13 }
 0x11a   : > { %1622 = vmatprep.subr.bf16.mxu0 %v2290_v14  ;;  %2035 = vmatprep.subr.bf16.mxu1 %v2290_v14 }
 0x11d   : > { %1623 = vmatpush2.bf16.msra.mxu0 %v2288_v15  ;;  %2051 = vmatpush2.bf16.msra.mxu1 %v2288_v15 }
 0x11e   : > { %1624 = vmatprep.subr.bf16.mxu0 %v2293_v16  ;;  %2036 = vmatprep.subr.bf16.mxu1 %v2293_v16 }
 0x121   : > { %1625 = vmatpush2.bf16.msra.mxu0 %v2291_v17  ;;  %2052 = vmatpush2.bf16.msra.mxu1 %v2291_v17 }
 0x122   : > { %1626 = vmatprep.subr.bf16.mxu0 %v2296_v18  ;;  %2037 = vmatprep.subr.bf16.mxu1 %v2296_v18 }
 0x125   : > { %1627 = vmatpush2.bf16.msra.mxu0 %v2294_v19  ;;  %2053 = vmatpush2.bf16.msra.mxu1 %v2294_v19 }
 0x126   : > { %1628 = vmatprep.subr.bf16.mxu0 %v2299_v20  ;;  %2038 = vmatprep.subr.bf16.mxu1 %v2299_v20 }
 0x129   : > { %1629 = vmatpush2.bf16.msra.mxu0 %v2297_v21  ;;  %2054 = vmatpush2.bf16.msra.mxu1 %v2297_v21 }
 0x12a   : > { %1630 = vmatprep.subr.bf16.mxu0 %v2302_v22  ;;  %2039 = vmatprep.subr.bf16.mxu1 %v2302_v22 }
 0x12d   : > { %1631 = vmatpush2.bf16.msra.mxu0 %v2300_v23  ;;  %2055 = vmatpush2.bf16.msra.mxu1 %v2300_v23 }
 0x17e   : > { %v643_v24 = vpop.f32.mrf.mxu0 }
 0x180   : > { %v645_v25 = vpop.f32.mrf.mxu0 }
 0x182   : > { %v647_v26 = vpop.f32.mrf.mxu0 }
 0x184   : > { %v649_v27 = vpop.f32.mrf.mxu0 }
 0x186   : > { %v653_v28 = vpop.f32.mrf.mxu0 }
 0x188   : > { %v655_v30 = vpop.f32.mrf.mxu0 }
 0x18a   : > { %v657_v31 = vpop.f32.mrf.mxu0 }
 0x18c   : > { %v659_v33 = vpop.f32.mrf.mxu0 }
 0x18e   : > { %v663_v34 = vpop.f32.mrf.mxu0 }
 0x190   : > { %v2966_v37 = vpop.f32.mrf.mxu0 }
 0x192   : > { %v2973_v40 = vpop.f32.mrf.mxu0 }
 0x194   : > { %v2982_v48 = vpop.f32.mrf.mxu0 }
 0x196   : > { %v2995_v59 = vpop.f32.mrf.mxu0 }
 0x198   : > { %v3007_v6 = vpop.f32.mrf.mxu0 }
 0x19a   : > { %v3020_v20 = vpop.f32.mrf.mxu0 }
 0x19b   : > { %v896_v41 = vpop.f32.mrf.mxu1 }
 0x19c   : > { %v897_v42 = vadd.f32 %v896_v41, %v643_v24 }
 0x19d   : > { %v898_v44 = vpop.f32.mrf.mxu1 }
 0x19e   : > { %v2980_v46 = vadd.f32 %v2971_v39, %v897_v42  ;;  %v899_v47 = vadd.f32 %v898_v44, %v645_v25 }
 0x19f   : > { %v900_v49 = vpop.f32.mrf.mxu1 }
 0x1a0   : > { %v991_v50 = vmul.f32 %v2980_v46, %v2980_v46  ;;  %v2987_v51 = vadd.f32 %v2977_v43, %v899_v47  ;;  %v901_v52 = vadd.f32 %v900_v49, %v647_v26  ;;  %v3039_v47 = vpop.f32.mrf.mxu0 }
 0x1a1   : > { %v902_v53 = vpop.f32.mrf.mxu1 }
 0x1a2   : > { %v1015_v54 = vmul.f32 %v991_v50, %v2980_v46  ;;  %v992_v56 = vmul.f32 %v2987_v51, %v2987_v51  ;;  %v2993_v57 = vadd.f32 %v2971_v39, %v901_v52  ;;  %v903_v58 = vadd.f32 %v902_v53, %v649_v27 }
 0x1a3   : > { %v906_v60 = vpop.f32.mrf.mxu1 }
 0x1a4   : > { %v1039_v61 = vmul.f32 0.044715, %v1015_v54  ;;  %v1016_v62 = vmul.f32 %v992_v56, %v2987_v51  ;;  %v993_v63 = vmul.f32 %v2993_v57, %v2993_v57  ;;  %v3001_v1 = vadd.f32 %v2977_v43, %v903_v58 }
 0x1a5   : > { %v907_v45 = vadd.f32 %v906_v60, %v653_v28  ;;  %v908_v2 = vpop.f32.mrf.mxu1 }
 0x1a6   : > { %v1063_v4 = vadd.f32 %v1039_v61, %v2980_v46  ;;  %v1040_v55 = vmul.f32 0.044715, %v1016_v62  ;;  %v1017_v5 = vmul.f32 %v993_v63, %v2993_v57  ;;  %v994_v3 = vmul.f32 %v3001_v1, %v3001_v1 }
 0x1a7   : > { %v3010_v7 = vadd.f32 %v2971_v39, %v907_v45  ;;  %v909_v8 = vadd.f32 %v908_v2, %v655_v30  ;;  %v910_v0 = vpop.f32.mrf.mxu1 }
 0x1a8   : > { %v1087_v9 = vmul.f32 0.7978846, %v1063_v4  ;;  %v1064_v10 = vadd.f32 %v1040_v55, %v2987_v51  ;;  %v1041_v11 = vmul.f32 0.044715, %v1017_v5  ;;  %v1018_v12 = vmul.f32 %v994_v3, %v3001_v1  ;;  %v683_v5 = vpop.f32.mrf.mxu0 }
 0x1a9   : > { %v995_v13 = vmul.f32 %v3010_v7, %v3010_v7  ;;  %v3017_v14 = vadd.f32 %v2977_v43, %v909_v8  ;;  %v911_v15 = vadd.f32 %v910_v0, %v657_v31  ;;  %v912_v16 = vpop.f32.mrf.mxu1 }
 0x1aa   : > { %2303 = vtanh.f32 %v1087_v9  ;;  %v1088_v17 = vmul.f32 0.7978846, %v1064_v10  ;;  %v1065_v18 = vadd.f32 %v1041_v11, %v2993_v57  ;;  %v1042_v19 = vmul.f32 0.044715, %v1018_v12 }
 0x1ab   : > { %v1019_v21 = vmul.f32 %v995_v13, %v3010_v7  ;;  %v996_v22 = vmul.f32 %v3017_v14, %v3017_v14  ;;  %v3026_v23 = vadd.f32 %v2971_v39, %v911_v15  ;;  %v913_v24 = vadd.f32 %v912_v16, %v659_v33  ;;  %v916_v25 = vpop.f32.mrf.mxu1 }
 0x1ac   : > { %v1089_v26 = vmul.f32 0.7978846, %v1065_v18  ;;  %v1066_v27 = vadd.f32 %v1042_v19, %v3001_v1  ;;  %v917_v28 = vadd.f32 %v916_v25, %v663_v34  ;;  %2305 = vtanh.f32 %v1088_v17 }
 0x1ad   : > { %v1043_v29 = vmul.f32 0.044715, %v1019_v21  ;;  %v1020_v30 = vmul.f32 %v996_v22, %v3017_v14  ;;  %v997_v31 = vmul.f32 %v3026_v23, %v3026_v23  ;;  %v3033_v36 = vadd.f32 %v2977_v43, %v913_v24  ;;  %v918_v41 = vpop.f32.mrf.mxu1  ;;  %v685_v22 = vpop.f32.mrf.mxu0 }
 0x1ae   : > { %v1090_v42 = vmul.f32 0.7978846, %v1066_v27  ;;  %v3036_v44 = vadd.f32 %v2971_v39, %v917_v28  ;;  %v919_v33 = vadd.f32 %v918_v41, %v2966_v37  ;;  %2307 = vtanh.f32 %v1089_v26 }
 0x1af   : > { %v1067_v34 = vadd.f32 %v1043_v29, %v3010_v7  ;;  %v1044_v49 = vmul.f32 0.044715, %v1020_v30  ;;  %v1021_v50 = vmul.f32 %v997_v31, %v3026_v23  ;;  %v998_v52 = vmul.f32 %v3033_v36, %v3033_v36  ;;  %v920_v53 = vpop.f32.mrf.mxu1 }
 0x1b0   : > { %v999_v54 = vmul.f32 %v3036_v44, %v3036_v44  ;;  %v3048_v56 = vadd.f32 %v2977_v43, %v919_v33  ;;  %v921_v37 = vadd.f32 %v920_v53, %v2973_v40  ;;  %2309 = vtanh.f32 %v1090_v42 }
 0x1b1   : > { %v1091_v58 = vmul.f32 0.7978846, %v1067_v34  ;;  %v1068_v60 = vadd.f32 %v1044_v49, %v3017_v14  ;;  %v1045_v61 = vmul.f32 0.044715, %v1021_v50  ;;  %v1022_v62 = vmul.f32 %v998_v52, %v3033_v36  ;;  %v922_v63 = vpop.f32.mrf.mxu1  ;;  %v687_v50 = vpop.f32.mrf.mxu0 }
 0x1b2   : > { %v1023_v45 = vmul.f32 %v999_v54, %v3036_v44  ;;  %v1000_v2 = vmul.f32 %v3048_v56, %v3048_v56  ;;  %v3057_v4 = vadd.f32 %v2971_v39, %v921_v37  ;;  %v923_v55 = vadd.f32 %v922_v63, %v2982_v48 }
 0x1b3   : > { %v1092_v40 = vmul.f32 0.7978846, %v1068_v60  ;;  %v1069_v3 = vadd.f32 %v1045_v61, %v3026_v23  ;;  %v1046_v8 = vmul.f32 0.044715, %v1022_v62  ;;  %v926_v0 = vpop.f32.mrf.mxu1  ;;  %2311 = vtanh.f32 %v1091_v58 }
 0x1b4   : > { %v1047_v9 = vmul.f32 0.044715, %v1023_v45  ;;  %v1024_v10 = vmul.f32 %v1000_v2, %v3048_v56  ;;  %v1001_v11 = vmul.f32 %v3057_v4, %v3057_v4  ;;  %v3065_v12 = vadd.f32 %v2977_v43, %v923_v55 }
 0x1b5   : > { %v1093_v13 = vmul.f32 0.7978846, %v1069_v3  ;;  %v1070_v48 = vadd.f32 %v1046_v8, %v3033_v36  ;;  %v927_v15 = vadd.f32 %v926_v0, %v2995_v59  ;;  %v928_v16 = vpop.f32.mrf.mxu1  ;;  %2313 = vtanh.f32 %v1092_v40  ;;  %v689_v0 = vpop.f32.mrf.mxu0 }
 0x1b6   : > { %v1071_v17 = vadd.f32 %v1047_v9, %v3036_v44  ;;  %v1048_v18 = vmul.f32 0.044715, %v1024_v10  ;;  %v1025_v19 = vmul.f32 %v1001_v11, %v3057_v4  ;;  %v1002_v21 = vmul.f32 %v3065_v12, %v3065_v12 }
 0x1b7   : > { %v2304_v24 = vpop.eup %2303  ;;  %v1094_v25 = vmul.f32 0.7978846, %v1070_v48  ;;  %v3074_v26 = vadd.f32 %v2971_v39, %v927_v15  ;;  %v929_v27 = vadd.f32 %v928_v16, %v3007_v6  ;;  %v930_v28 = vpop.f32.mrf.mxu1  ;;  %2315 = vtanh.f32 %v1093_v13 }
 0x1b8   : > { %v1135_v59 = vadd.f32 1.0, %v2304_v24  ;;  %v1095_v29 = vmul.f32 0.7978846, %v1071_v17  ;;  %v1072_v30 = vadd.f32 %v1048_v18, %v3048_v56  ;;  %v1049_v31 = vmul.f32 0.044715, %v1025_v19 }
 0x1b9   : > { %v1026_v41 = vmul.f32 %v1002_v21, %v3065_v12  ;;  %v1003_v42 = vmul.f32 %v3074_v26, %v3074_v26  ;;  %v3082_v33 = vadd.f32 %v2977_v43, %v929_v27  ;;  %v932_v34 = vpop.f32.mrf.mxu1  ;;  %v3085_v52 = vpop.eup %2305  ;;  %v931_v58 = vadd.f32 %v930_v28, %v3020_v20 }
 0x1ba   : > { %v1159_v49 = vmul.f32 0.5, %v1135_v59  ;;  %2317 = vtanh.f32 %v1095_v29  ;;  %v1073_v6 = vadd.f32 %v1049_v31, %v3057_v4  ;;  %v1096_v61 = vmul.f32 0.7978846, %v1072_v30  ;;  %v693_v28 = vpop.f32.mrf.mxu0 }
 0x1bb   : > { %v1050_v53 = vmul.f32 0.044715, %v1026_v41  ;;  %v1027_v54 = vmul.f32 %v1003_v42, %v3074_v26  ;;  %v1004_v37 = vmul.f32 %v3082_v33, %v3082_v33  ;;  %v936_v60 = vpop.f32.mrf.mxu1  ;;  %2319 = vtanh.f32 %v1094_v25  ;;  %v2308_v63 = vpop.eup %2307 }
 0x1bc   : > { %v1097_v62 = vmul.f32 0.7978846, %v1073_v6  ;;  %v3094_v40 = vadd.f32 %v2971_v39, %v931_v58  ;;  %v3097_v8 = vmul.f32 %v1159_v49, %v2980_v46  ;;  %v933_v20 = vadd.f32 %v932_v34, %v3039_v47 }
 0x1bd   : > { %v1074_v45 = vadd.f32 %v1050_v53, %v3065_v12  ;;  %v1051_v2 = vmul.f32 0.044715, %v1027_v54  ;;  %v1028_v55 = vmul.f32 %v1004_v37, %v3082_v33  ;;  %v938_v3 = vpop.f32.mrf.mxu1  ;;  %v937_v9 = vadd.f32 %v936_v60, %v683_v5  ;;  %v3103_v16 = vpop.eup %2309 }
 0x1be   : > { %2321 = vtanh.f32 %v1097_v62  ;;  %v1005_v48 = vmul.f32 %v3094_v40, %v3094_v40  ;;  %v3106_v17 = vadd.f32 %v2977_v43, %v933_v20  ;;  %v939_v47 = vadd.f32 %v938_v3, %v685_v22 }
 0x1bf   : > { %v1098_v10 = vmul.f32 0.7978846, %v1074_v45  ;;  %v1075_v11 = vadd.f32 %v1051_v2, %v3074_v26  ;;  %v1052_v13 = vmul.f32 0.044715, %v1028_v55  ;;  %v940_v15 = vpop.f32.mrf.mxu1  ;;  %2323 = vtanh.f32 %v1096_v61  ;;  %v695_v2 = vpop.f32.mrf.mxu0 }
 0x1c0   : > { %v3109_v46 = vadd.f32 %v2971_v39, %v937_v9  ;;  %v1029_v19 = vmul.f32 %v1005_v48, %v3094_v40  ;;  %v3113_v24 = vpop.eup %2311  ;;  %v1006_v25 = vmul.f32 %v3106_v17, %v3106_v17  ;;  %v3120_v59 = vadd.f32 %v2977_v43, %v939_v47 }
 0x1c1   : > { %2325 = vtanh.f32 %v1098_v10  ;;  %v1099_v5 = vmul.f32 0.7978846, %v1075_v11  ;;  %v1076_v18 = vadd.f32 %v1052_v13, %v3082_v33  ;;  %v942_v21 = vpop.f32.mrf.mxu1  ;;  %v941_v22 = vadd.f32 %v940_v15, %v687_v50 }
 0x1c2   : > { %v1007_v27 = vmul.f32 %v3109_v46, %v3109_v46  ;;  %v1137_v29 = vadd.f32 1.0, %v2308_v63  ;;  %v1053_v30 = vmul.f32 0.044715, %v1029_v19  ;;  %v943_v31 = vadd.f32 %v942_v21, %v689_v0  ;;  %v3122_v42 = vpop.eup %2313 }
 0x1c3   : > { %2327 = vtanh.f32 %v1099_v5  ;;  %v946_v41 = vpop.f32.mrf.mxu1  ;;  %v1030_v34 = vmul.f32 %v1006_v25, %v3106_v17  ;;  %v1008_v6 = vmul.f32 %v3120_v59, %v3120_v59  ;;  %v3129_v53 = vadd.f32 %v2971_v39, %v941_v22 }
 0x1c4   : > { %v1031_v49 = vmul.f32 %v1007_v27, %v3109_v46  ;;  %v1100_v54 = vmul.f32 0.7978846, %v1076_v18  ;;  %v1077_v50 = vadd.f32 %v1053_v30, %v3094_v40  ;;  %v3133_v37 = vadd.f32 %v2977_v43, %v943_v31  ;;  %v3135_v61 = vpop.eup %2315 }
 0x1c5   : > { %v947_v58 = vadd.f32 %v946_v41, %v693_v28  ;;  %v948_v60 = vpop.f32.mrf.mxu1  ;;  %v1054_v62 = vmul.f32 0.044715, %v1030_v34  ;;  %v1032_v45 = vmul.f32 %v1008_v6, %v3120_v59  ;;  %v1009_v55 = vmul.f32 %v3129_v53, %v3129_v53 }
 0x1c6   : > { %v1055_v63 = vmul.f32 0.044715, %v1031_v49  ;;  %v1101_v20 = vmul.f32 0.7978846, %v1077_v50  ;;  %v1010_v0 = vmul.f32 %v3133_v37, %v3133_v37  ;;  %v949_v10 = vadd.f32 %v948_v60, %v695_v2  ;;  %v697_v2 = vpop.f32.mrf.mxu0 }
 0x1c7   : > { %v2318_v3 = vpop.eup %2317  ;;  %v3143_v9 = vadd.f32 %v2971_v39, %v947_v58  ;;  %v1078_v13 = vadd.f32 %v1054_v62, %v3106_v17  ;;  %v1056_v15 = vmul.f32 0.044715, %v1032_v45  ;;  %2329 = vtanh.f32 %v1100_v54  ;;  %v950_v54 = vpop.f32.mrf.mxu1 }
 0x1c8   : > { %v1143_v11 = vadd.f32 1.0, %v2318_v3  ;;  %v1079_v48 = vadd.f32 %v1055_v63, %v3109_v46  ;;  %v2320_v47 = vpop.eup %2319  ;;  %v1033_v5 = vmul.f32 %v1009_v55, %v3129_v53  ;;  %v1034_v18 = vmul.f32 %v1010_v0, %v3133_v37 }
 0x1c9   : > { %v1011_v19 = vmul.f32 %v3143_v9, %v3143_v9  ;;  %v1161_v21 = vmul.f32 0.5, %v1137_v29  ;;  %2331 = vtanh.f32 %v1101_v20  ;;  %v1102_v25 = vmul.f32 0.7978846, %v1078_v13 }
 0x1ca   : > { %v1080_v27 = vadd.f32 %v1056_v15, %v3120_v59  ;;  %v1057_v22 = vmul.f32 0.044715, %v1033_v5  ;;  %v1058_v30 = vmul.f32 0.044715, %v1034_v18  ;;  %v3154_v41 = vadd.f32 %v2977_v43, %v949_v10  ;;  %v952_v5 = vpop.f32.mrf.mxu1 }
 0x1cb   : > { %v2322_v28 = vpop.eup %2321  ;;  %v1035_v31 = vmul.f32 %v1011_v19, %v3143_v9  ;;  %v1167_v34 = vmul.f32 0.5, %v1143_v11  ;;  %2333 = vtanh.f32 %v1102_v25  ;;  %v1103_v49 = vmul.f32 0.7978846, %v1079_v48 }
 0x1cc   : > { %v1104_v6 = vmul.f32 0.7978846, %v1080_v27  ;;  %v2324_v50 = vpop.eup %2323  ;;  %v1145_v58 = vadd.f32 1.0, %v2322_v28  ;;  %v1081_v29 = vadd.f32 %v1057_v22, %v3129_v53  ;;  %v1082_v60 = vadd.f32 %v1058_v30, %v3133_v37 }
 0x1cd   : > { %v1059_v62 = vmul.f32 0.044715, %v1035_v31  ;;  %v1185_v45 = vmul.f32 %v1161_v21, %v2993_v57  ;;  %v1012_v55 = vmul.f32 %v3154_v41, %v3154_v41  ;;  %v1136_v3 = vadd.f32 1.0, %v3085_v52  ;;  %v699_v21 = vpop.f32.mrf.mxu0 }
 0x1ce   : > { %v2326_v63 = vpop.eup %2325  ;;  %2335 = vtanh.f32 %v1104_v6  ;;  %v1105_v20 = vmul.f32 0.7978846, %v1081_v29  ;;  %v1106_v0 = vmul.f32 0.7978846, %v1082_v60  ;;  %v1138_v11 = vadd.f32 1.0, %v3103_v16 }
 0x1cf   : > { %v1083_v10 = vadd.f32 %v1059_v62, %v3143_v9  ;;  %2337 = vtanh.f32 %v1103_v49  ;;  %v1036_v48 = vmul.f32 %v1012_v55, %v3154_v41  ;;  %v1160_v15 = vmul.f32 0.5, %v1136_v3 }
 0x1d0   : > { %v3164_v13 = vpop.eup %2327  ;;  %v951_v57 = vadd.f32 %v950_v54, %v697_v2  ;;  %v3168_v18 = vmul.f32 %v1167_v34, %v3036_v44  ;;  %v1169_v19 = vmul.f32 0.5, %v1145_v58  ;;  %2339 = vtanh.f32 %v1105_v20 }
 0x1d1   : > { %v1162_v52 = vmul.f32 0.5, %v1138_v11  ;;  %2341 = vtanh.f32 %v1106_v0  ;;  %v1107_v25 = vmul.f32 0.7978846, %v1083_v10  ;;  %v1060_v27 = vmul.f32 0.044715, %v1036_v48 }
 0x1d2   : > { %v3171_v16 = vadd.f32 %v2971_v39, %v951_v57  ;;  %v1184_v28 = vmul.f32 %v1160_v15, %v2987_v51  ;;  %v953_v30 = vadd.f32 %v952_v5, %v699_v21  ;;  %v1140_v31 = vadd.f32 1.0, %v3122_v42 }
 0x1d3   : > { %v1186_v22 = vmul.f32 %v1162_v52, %v3001_v1  ;;  %v1084_v44 = vadd.f32 %v1060_v27, %v3154_v41  ;;  %v1142_v49 = vadd.f32 1.0, %v2320_v47  ;;  %v1139_v6 = vadd.f32 1.0, %v3113_v24 }
 0x1d4   : > { %v1013_v34 = vmul.f32 %v3171_v16, %v3171_v16  ;;  %v3181_v58 = vadd.f32 %v2977_v43, %v953_v30  ;;  %v1164_v39 = vmul.f32 0.5, %v1140_v31  ;;  %v1141_v51 = vadd.f32 1.0, %v3135_v61  ;;  %v2330_v29 = vpop.eup %2329 }
 0x1d5   : > { %v1208_v54 = vpack.c.bf16 %v1186_v22, %v1184_v28  ;;  %v1108_v1 = vmul.f32 0.7978846, %v1084_v44  ;;  %v1207_v42 = vpack.c.bf16 %v1185_v45, %v3097_v8  ;;  %v1166_v62 = vmul.f32 0.5, %v1142_v49 }
 0x1d6   : > { %v1037_v60 = vmul.f32 %v1013_v34, %v3171_v16  ;;  %v2332_v2 = vpop.eup %2331  ;;  %v1014_v47 = vmul.f32 %v3181_v58, %v3181_v58  ;;  %v1163_v24 = vmul.f32 0.5, %v1139_v6  ;;  %v1165_v55 = vmul.f32 0.5, %v1141_v51 }
 0x1d7   : > { %1632 = vmatprep.mubr.bf16.mxu0 %v1208_v54  ;;  %v1144_v3 = vadd.f32 1.0, %v2324_v50  ;;  %v1193_v43 = vmul.f32 %v1169_v19, %v3057_v4  ;;  %v1188_v61 = vmul.f32 %v1164_v39, %v3017_v14  ;;  %v1190_v0 = vmul.f32 %v1166_v62, %v3033_v36 }
 0x1d8   : > { %v1061_v20 = vmul.f32 0.044715, %v1037_v60  ;;  %1633 = vmatmul.mubr.bf16.vlgmr.msra.gmra.mxu0 %v1207_v42  ;;  %v2334_v10 = vpop.eup %2333  ;;  %2343 = vtanh.f32 %v1107_v25  ;;  %v1038_v8 = vmul.f32 %v1014_v47, %v3181_v58  ;;  %v1146_v45 = vadd.f32 1.0, %v2326_v63 }
 0x1d9   : > { %v1168_v11 = vmul.f32 0.5, %v1144_v3  ;;  %v1210_v15 = vpack.c.bf16 %v1190_v0, %v1188_v61  ;;  %v1189_v57 = vmul.f32 %v1165_v55, %v3026_v23  ;;  %v1148_v50 = vadd.f32 1.0, %v2330_v29 }
 0x1da   : > { %v1085_v48 = vadd.f32 %v1061_v20, %v3171_v16  ;;  %2345 = vtanh.f32 %v1108_v1  ;;  %v1062_v4 = vmul.f32 0.044715, %v1038_v8  ;;  %v1187_v19 = vmul.f32 %v1163_v24, %v3010_v7 }
 0x1db   : > { %v2336_v5 = vpop.eup %2335  ;;  %v1170_v14 = vmul.f32 0.5, %v1146_v45  ;;  %1642 = vmatprep.mubr.bf16.mxu0 %v1210_v15  ;;  %v1192_v36 = vmul.f32 %v1168_v11, %v3048_v56  ;;  %v1150_v21 = vadd.f32 1.0, %v2334_v10  ;;  %v1172_v25 = vmul.f32 0.5, %v1148_v50 }
 0x1dc   : > { %v1109_v52 = vmul.f32 0.7978846, %v1085_v48  ;;  %v2338_v63 = vpop.eup %2337  ;;  %v1086_v27 = vadd.f32 %v1062_v4, %v3181_v58  ;;  %v1149_v22 = vadd.f32 1.0, %v2332_v2  ;;  %v1152_v23 = vadd.f32 1.0, %v2336_v5 }
 0x1dd   : > { %v1194_v28 = vmul.f32 %v1170_v14, %v3065_v12  ;;  %v2340_v30 = vpop.eup %2339  ;;  %v1209_v31 = vpack.c.bf16 %v1189_v57, %v1187_v19  ;;  %v1174_v44 = vmul.f32 0.5, %v1150_v21  ;;  %v1147_v7 = vadd.f32 1.0, %v3164_v13 }
 0x1de   : > { %2347 = vtanh.f32 %v1109_v52  ;;  %v2342_v34 = vpop.eup %2341  ;;  %v1110_v49 = vmul.f32 0.7978846, %v1086_v27  ;;  %v1211_v56 = vpack.c.bf16 %v1193_v43, %v3168_v18  ;;  %v1196_v54 = vmul.f32 %v1172_v25, %v3082_v33 }
 0x1df   : > { %v1212_v6 = vpack.c.bf16 %v1194_v28, %v1192_v36  ;;  %v1198_v39 = vmul.f32 %v1174_v44, %v3106_v17  ;;  %v1173_v51 = vmul.f32 0.5, %v1149_v22  ;;  %v1154_v12 = vadd.f32 1.0, %v2342_v34 }
 0x1e0   : > { %1643 = vmatmul.mubr.bf16.gmra.mxu0 %v1209_v31  ;;  %2349 = vtanh.f32 %v1110_v49  ;;  %v1176_v29 = vmul.f32 0.5, %v1152_v23  ;;  %v1171_v60 = vmul.f32 0.5, %v1147_v7  ;;  %v1153_v18 = vadd.f32 1.0, %v2340_v30 }
 0x1e1   : > { %1652 = vmatprep.mubr.bf16.mxu1 %v1212_v6  ;;  %v1214_v1 = vpack.c.bf16 %v1198_v39, %v1196_v54  ;;  %v1178_v42 = vmul.f32 0.5, %v1154_v12  ;;  %v1197_v13 = vmul.f32 %v1173_v51, %v3094_v40  ;;  %v1151_v47 = vadd.f32 1.0, %v2338_v63  ;;  %v1693_v51 = vld [vmem:[%s3367_s7] sm:$0x3] }
 0x1e2   : > { %1653 = vmatmul.mubr.bf16.vlgmr.msra.gmra.mxu1 %v1211_v56  ;;  %v1200_v2 = vmul.f32 %v1176_v29, %v3120_v59  ;;  %v1195_v17 = vmul.f32 %v1171_v60, %v3074_v26  ;;  %v1177_v43 = vmul.f32 0.5, %v1153_v18  ;;  %v3241_v12 = vrot.slane %v1693_v51, %v959_v35 }
 0x1e3   : > { %1662 = vmatprep.mubr.bf16.mxu1 %v1214_v1  ;;  %v1202_v62 = vmul.f32 %v1178_v42, %v3133_v37  ;;  %v1175_v20 = vmul.f32 0.5, %v1151_v47  ;;  %v3245_v60 = vrot.slane %v1693_v51, %v963_v38 }
 0x1e4   : > { %v1213_v3 = vpack.c.bf16 %v1197_v13, %v1195_v17  ;;  %v1201_v40 = vmul.f32 %v1177_v43, %v3129_v53 }
 0x1e5   : > { %v2344_v33 = vpop.eup %2343  ;;  %v1216_v24 = vpack.c.bf16 %v1202_v62, %v1200_v2  ;;  %v1199_v8 = vmul.f32 %v1175_v20, %v3109_v46  ;;  %v1381_v46 = vpop.f32.mrf.mxu0 }
 0x1e6   : > { %v1155_v59 = vadd.f32 1.0, %v2344_v33 }
 0x1e7   : > { %v2346_v55 = vpop.eup %2345  ;;  %v1215_v26 = vpack.c.bf16 %v1201_v40, %v1199_v8  ;;  %v1383_v52 = vpop.f32.mrf.mxu0 }
 0x1e8   : > { %v1156_v0 = vadd.f32 1.0, %v2346_v55  ;;  %v1179_v57 = vmul.f32 0.5, %v1155_v59 }
 0x1e9   : > { %v1385_v36 = vpop.f32.mrf.mxu0 }
 0x1ea   : > { %1663 = vmatmul.mubr.bf16.gmra.mxu1 %v1213_v3  ;;  %v1180_v11 = vmul.f32 0.5, %v1156_v0  ;;  %v1203_v53 = vmul.f32 %v1179_v57, %v3143_v9 }
 0x1eb   : > { %v2348_v61 = vpop.eup %2347  ;;  %1672 = vmatprep.mubr.bf16.mxu1 %v1216_v24  ;;  %v1387_v21 = vpop.f32.mrf.mxu0 }
 0x1ec   : > { %v1157_v10 = vadd.f32 1.0, %v2348_v61  ;;  %v1204_v50 = vmul.f32 %v1180_v11, %v3154_v41 }
 0x1ed   : > { %v2350_v37 = vpop.eup %2349  ;;  %v1391_v25 = vpop.f32.mrf.mxu0 }
 0x1ee   : > { %v1158_v45 = vadd.f32 1.0, %v2350_v37  ;;  %v1181_v48 = vmul.f32 0.5, %v1157_v10 }
 0x1ef   : > { %v1393_v63 = vpop.f32.mrf.mxu0 }
 0x1f0   : > { %v1182_v15 = vmul.f32 0.5, %v1158_v45  ;;  %v1205_v4 = vmul.f32 %v1181_v48, %v3171_v16 }
 0x1f1   : > { %v1395_v27 = vpop.f32.mrf.mxu0 }
 0x1f2   : > { %1673 = vmatmul.mubr.bf16.gmra.mxu1 %v1215_v26  ;;  %v1206_v5 = vmul.f32 %v1182_v15, %v3181_v58  ;;  %v1217_v14 = vpack.c.bf16 %v1205_v4, %v1203_v53 }
 0x1f3   : > { %v1397_v28 = vpop.f32.mrf.mxu0 }
 0x1f4   : > { %v1218_v19 = vpack.c.bf16 %v1206_v5, %v1204_v50 }
 0x1f5   : > { %v1401_v22 = vpop.f32.mrf.mxu0 }
 0x1f6   : > { %1682 = vmatprep.mubr.bf16.mxu1 %v1218_v19 }
 0x1f7   : > { %v1403_v41 = vpop.f32.mrf.mxu0 }
 0x1f9   : > { %v1405_v23 = vpop.f32.mrf.mxu0 }
 0x1fa   : > { %1683 = vmatmul.mubr.bf16.gmra.mxu1 %v1217_v14 }
 0x1fb   : > { %v1407_v58 = vpop.f32.mrf.mxu0 }
 0x1fd   : > { %v3212_v30 = vpop.f32.mrf.mxu0 }
 0x1ff   : > { %v3214_v16 = vpop.f32.mrf.mxu0 }
 0x201   : > { %v3216_v9 = vpop.f32.mrf.mxu0 }
 0x203   : > { %v3218_v31 = vpop.f32.mrf.mxu0 }
 0x205   : > { %v3220_v44 = vpop.f32.mrf.mxu0 }
 0x207   : > { %v3222_v7 = vpop.f32.mrf.mxu0 }
 0x209   : > { %v3224_v34 = vpop.f32.mrf.mxu0 }
 0x20b   : > { %v3226_v49 = vpop.f32.mrf.mxu0 }
 0x20d   : > { %v3228_v6 = vpop.f32.mrf.mxu0 }
 0x20f   : > { %v3230_v56 = vpop.f32.mrf.mxu0 }
 0x211   : > { %v3232_v54 = vpop.f32.mrf.mxu0 }
 0x213   : > { %v3234_v39 = vpop.f32.mrf.mxu0 }
 0x298   : > { %v1634_v29 = vpop.f32.mrf.mxu0 }
 0x299   : > { %v1635_v1 = vadd.f32 %v1634_v29, %v1381_v46 }
 0x29a   : > { %v1636_v42 = vpop.f32.mrf.mxu0 }
 0x29b   : > { %v1705_v13 = vadd.f32 %v3241_v12, %v1635_v1  ;;  %v1637_v62 = vadd.f32 %v1636_v42, %v1383_v52 }
 0x29c   : > { %v1638_v18 = vpop.f32.mrf.mxu0 }
 0x29d   : > { %1729 = vst [vmem:[%s3250_s2] sm:$0xff] %v1705_v13  ;;  %v1706_v35 = vadd.f32 %v3245_v60, %v1637_v62  ;;  %v1639_v2 = vadd.f32 %v1638_v18, %v1385_v36 }
 0x29e   : > { %v1640_v33 = vpop.f32.mrf.mxu0 }
 0x29f   : > { %1730 = vst [vmem:[%s3250_s2 + $0x8] sm:$0xff] %v1706_v35  ;;  %v1707_v32 = vadd.f32 %v3241_v12, %v1639_v2  ;;  %v1641_v38 = vadd.f32 %v1640_v33, %v1387_v21 }
 0x2a0   : > { %v1644_v17 = vpop.f32.mrf.mxu0 }
 0x2a1   : > { %1731 = vst [vmem:[%s3250_s2 + $0x10] sm:$0xff] %v1707_v32  ;;  %v1708_v47 = vadd.f32 %v3245_v60, %v1641_v38  ;;  %v1645_v24 = vadd.f32 %v1644_v17, %v1391_v25 }
 0x2a2   : > { %v1646_v55 = vpop.f32.mrf.mxu0  ;;  %v1654_v3 = vpop.f32.mrf.mxu1 }
 0x2a3   : > { %1732 = vst [vmem:[%s3250_s2 + $0x18] sm:$0xff] %v1708_v47  ;;  %v1709_v43 = vadd.f32 %v3241_v12, %v1645_v24  ;;  %v1647_v20 = vadd.f32 %v1646_v55, %v1393_v63  ;;  %v1655_v61 = vadd.f32 %v1654_v3, %v1401_v22 }
 0x2a4   : > { %v1648_v0 = vpop.f32.mrf.mxu0  ;;  %v1656_v40 = vpop.f32.mrf.mxu1 }
 0x2a5   : > { %1733 = vst [vmem:[%s3250_s2 + $0x20] sm:$0xff] %v1709_v43  ;;  %v1710_v10 = vadd.f32 %v3245_v60, %v1647_v20  ;;  %v1649_v37 = vadd.f32 %v1648_v0, %v1395_v27  ;;  %v1713_v8 = vadd.f32 %v3241_v12, %v1655_v61  ;;  %v1657_v59 = vadd.f32 %v1656_v40, %v1403_v41 }
 0x2a6   : > { %v1650_v45 = vpop.f32.mrf.mxu0  ;;  %v1658_v11 = vpop.f32.mrf.mxu1 }
 0x2a7   : > { %1734 = vst [vmem:[%s3250_s2 + $0x28] sm:$0xff] %v1710_v10  ;;  %v1711_v26 = vadd.f32 %v3241_v12, %v1649_v37  ;;  %v1651_v48 = vadd.f32 %v1650_v45, %v1397_v28  ;;  %1737 = vst [vmem:[%s3250_s2 + $0x40] sm:$0xff] %v1713_v8  ;;  %v1714_v15 = vadd.f32 %v3245_v60, %v1657_v59 }
 0x2a8   : > { %v1659_v57 = vadd.f32 %v1658_v11, %v1405_v23  ;;  %v1660_v50 = vpop.f32.mrf.mxu1 }
 0x2a9   : > { %1735 = vst [vmem:[%s3250_s2 + $0x30] sm:$0xff] %v1711_v26  ;;  %v1712_v5 = vadd.f32 %v3245_v60, %v1651_v48  ;;  %1738 = vst [vmem:[%s3250_s2 + $0x48] sm:$0xff] %v1714_v15  ;;  %v1661_v19 = vadd.f32 %v1660_v50, %v1407_v58 }
 0x2aa   : > { %v1715_v4 = vadd.f32 %v3241_v12, %v1659_v57  ;;  %v1664_v53 = vpop.f32.mrf.mxu1 }
 0x2ab   : > { %1736 = vst [vmem:[%s3250_s2 + $0x38] sm:$0xff] %v1712_v5  ;;  %v1716_v14 = vadd.f32 %v3245_v60, %v1661_v19  ;;  %v1665_v46 = vadd.f32 %v1664_v53, %v3212_v30 }
 0x2ac   : > { %1739 = vst [vmem:[%s3250_s2 + $0x50] sm:$0xff] %v1715_v4  ;;  %v1666_v52 = vpop.f32.mrf.mxu1 }
 0x2ad   : > { %1740 = vst [vmem:[%s3250_s2 + $0x58] sm:$0xff] %v1716_v14  ;;  %v1717_v36 = vadd.f32 %v3241_v12, %v1665_v46  ;;  %v1667_v21 = vadd.f32 %v1666_v52, %v3214_v16 }
 0x2ae   : > { %v1668_v25 = vpop.f32.mrf.mxu1 }
 0x2af   : > { %1741 = vst [vmem:[%s3250_s2 + $0x60] sm:$0xff] %v1717_v36  ;;  %v1718_v63 = vadd.f32 %v3245_v60, %v1667_v21  ;;  %v1669_v27 = vadd.f32 %v1668_v25, %v3216_v9 }
 0x2b0   : > { %v1670_v28 = vpop.f32.mrf.mxu1 }
 0x2b1   : > { %1742 = vst [vmem:[%s3250_s2 + $0x68] sm:$0xff] %v1718_v63  ;;  %v1719_v22 = vadd.f32 %v3241_v12, %v1669_v27  ;;  %v1671_v41 = vadd.f32 %v1670_v28, %v3218_v31 }
 0x2b2   : > { %v1674_v23 = vpop.f32.mrf.mxu1 }
 0x2b3   : > { %1743 = vst [vmem:[%s3250_s2 + $0x70] sm:$0xff] %v1719_v22  ;;  %v1720_v58 = vadd.f32 %v3245_v60, %v1671_v41  ;;  %v1675_v30 = vadd.f32 %v1674_v23, %v3220_v44 }
 0x2b4   : > { %v1676_v16 = vpop.f32.mrf.mxu1 }
 0x2b5   : > { %1744 = vst [vmem:[%s3250_s2 + $0x78] sm:$0xff] %v1720_v58  ;;  %v1721_v51 = vadd.f32 %v3241_v12, %v1675_v30  ;;  %v1677_v9 = vadd.f32 %v1676_v16, %v3222_v7 }
 0x2b6   : > { %v1678_v29 = vpop.f32.mrf.mxu1 }
 0x2b7   : > { %1745 = vst [vmem:[%s3250_s2 + $0x80] sm:$0xff] %v1721_v51  ;;  %v1722_v1 = vadd.f32 %v3245_v60, %v1677_v9  ;;  %v1679_v31 = vadd.f32 %v1678_v29, %v3224_v34 }
 0x2b8   : > { %v1680_v42 = vpop.f32.mrf.mxu1 }
 0x2b9   : > { %1746 = vst [vmem:[%s3250_s2 + $0x88] sm:$0xff] %v1722_v1  ;;  %v1723_v13 = vadd.f32 %v3241_v12, %v1679_v31  ;;  %v1681_v44 = vadd.f32 %v1680_v42, %v3226_v49 }
 0x2ba   : > { %v1684_v62 = vpop.f32.mrf.mxu1 }
 0x2bb   : > { %1747 = vst [vmem:[%s3250_s2 + $0x90] sm:$0xff] %v1723_v13  ;;  %v1724_v7 = vadd.f32 %v3245_v60, %v1681_v44  ;;  %v1685_v18 = vadd.f32 %v1684_v62, %v3228_v6 }
 0x2bc   : > { %v1686_v35 = vpop.f32.mrf.mxu1 }
 0x2bd   : > { %1748 = vst [vmem:[%s3250_s2 + $0x98] sm:$0xff] %v1724_v7  ;;  %v1725_v2 = vadd.f32 %v3241_v12, %v1685_v18  ;;  %v1687_v34 = vadd.f32 %v1686_v35, %v3230_v56 }
 0x2be   : > { %v1688_v33 = vpop.f32.mrf.mxu1 }
 0x2bf   : > { %1749 = vst [vmem:[%s3250_s2 + $0xa0] sm:$0xff] %v1725_v2  ;;  %v1726_v49 = vadd.f32 %v3245_v60, %v1687_v34  ;;  %v1689_v32 = vadd.f32 %v1688_v33, %v3232_v54 }
 0x2c0   : > { %v1690_v38 = vpop.f32.mrf.mxu1 }
 0x2c1   : > { %1750 = vst [vmem:[%s3250_s2 + $0xa8] sm:$0xff] %v1726_v49  ;;  %v1727_v6 = vadd.f32 %v3241_v12, %v1689_v32  ;;  %v1691_v17 = vadd.f32 %v1690_v38, %v3234_v39 }
 0x2c3   : > { %1751 = vst [vmem:[%s3250_s2 + $0xb0] sm:$0xff] %v1727_v6  ;;  %v1728_v56 = vadd.f32 %v3245_v60, %v1691_v17 }
 0x2c5   : > { %1752 = vst [vmem:[%s3250_s2 + $0xb8] sm:$0xff] %v1728_v56 }
 0x2c6   : > { %2524 = shalt.err (!%p2521_p0)
}
 0x2c7   : > { %s2525_s6 = scalar_lea.hbm %s3313_s15, 3072  ;;  %s2529_s24 = scalar_lea.hbm %s3368_s8, 12288 }
 0x2c8   : > { %p2526_p8 = scmp.ne.s32.totalorder %s3313_s15, %s2525_s6  ;;  %p2530_p7 = scmp.lt.s32.totalorder %s3313_s15, %s3368_s8 }
 0x2c9   : > { %p2531_p1 = scmp.lt.s32.totalorder %s2529_s24, %s2525_s6 }
 0x2ca   : > { %p2527_p10 = pnand %p2526_p8, %p3401_p2 }
 0x2cb   : > { %p2532_p12 = por %p2531_p1, %p2530_p7 }
 0x2cc   : > { %p2528_p9 = pneg %p2527_p10 }
 0x2ce   : > { %p2533_p13 = pnand %p2532_p12, %p2528_p9 }
 0x2d0   : > { %2536 = shalt.err (!%p2533_p13)
}
 0x2d1   : > { %s2605_s25 = smov 256   ;;  %s2606_s10 = smov 16  }
 0x2d2   : > { %2080 = dma.vmem_to_hbm [thread:$0]  (%p3401_p2), %s3317_s3, 3072, %s3313_s15, %s1754_s9, %s2605_s25, %s2605_s25, %s2606_s10  }
 0x2d3 PF: > { %p2115_p3 = scmp.ge.s32.totalorder %s2591_s30, 2  ;;  %s1783_s2 = sand.u32 1, %s2579_s27  }
 0x2d4   : > { %p3402_p11 = scmp.ne.s32.totalorder %s3380_s12, 0  ;;  %s1784_s0 = scalar_lea.sflag [#allocation4], %s1783_s2 }
 0x2d6   : > { %p2103_p4 = pnand %p2115_p3, %p3402_p11 }
 0x2d8   : > { %p2104_p6 = pneg %p2103_p4 }
 0x2da   : > { %2574 = dma.done.wait (%p2104_p6), %s1784_s0, 3072  }
 0x2db   : > { %2576 = vsyncadd (%p2104_p6), %s1784_s0, 4294964224  ;;  %s3403_s5 = sld [smem:[#allocation20_spill]]  ;;  %p26_p5 = scmp.ge.s32.totalorder %s2751_s26, 6  }
 0x2dc   : > { %s3404_s27 = smov %s2583_s28  ;;  %s3405_s28 = smov %s2587_s29 }
 0x2dd   : > { %s3407_s30 = smov %s2751_s26  ;;  %28 = sbr.rel (!%p26_p5) target bundleno = 15 (0xf), region = 126 }
 0x2e1   : > { %s3406_s29 = smov %s3403_s5 }
 0x2e2   :  { %1789 = vsyncpa [#allocation3], 1 }
 0x2e3   :  { %1791 = vsyncpa [#allocation3 + $0x1], 1 }
 0x2e4   :  { %1792 = vsyncpa [#allocation6], 1 }
 0x2e5   :  { %1794 = vsyncpa [#allocation6 + $0x1], 1 }
 0x2e6   :  { %1795 = vsyncpa [#allocation9], 1 }
 0x2e7   :  { %1796 = vsyncpa [#allocation12], 1 }
 0x2e8   :  { %1797 = vsyncpa [#allocation4], 1 }
 0x2e9   :  { %1799 = vsyncpa [#allocation4 + $0x1], 1 }

</bundles_post_ra>
